<compile_context>
chip_gen: v7x
topology: tpu7x:2x2x1
jax: 0.10.0
libtpu: 0.0.40
codegen_flags: <defaults>
</compile_context>

<pallas_src>
import functools
import math

import jax
import jax.numpy as jnp
from jax.experimental import pallas as pl
from jax.experimental.pallas import tpu as pltpu


# --------------------------------------------------------------------------
# Kernel
# --------------------------------------------------------------------------
def _attn_kernel(x_ref, wqkv_ref, bqkv_ref, wout_ref, bout_ref, y_ref,
                 q_scr, k_scr, v_scr, o_scr, *, n_heads, d_head):
    # x_ref:    (Bt, T, E)  bf16
    # wqkv_ref: (E, 3E)     bf16  (x @ W layout; 1/sqrt(D) folded into Q cols)
    # bqkv_ref: (1, 3E)     f32   (scale folded into Q part)
    # wout_ref: (E, E)      bf16  (x @ W layout)
    # bout_ref: (1, E)      f32
    # y_ref:    (Bt, T, E)  bf16
    # q/k/v_scr: (Bt*H, T, D) bf16 ; o_scr: (Bt*T, E) bf16
    Bt, T, E = x_ref.shape
    H, D = n_heads, d_head

    # ---- Fused QKV projection: one lane-dense (T,E)@(E,3E) matmul per
    # sequence, full MXU width/depth, f32 accumulation, bias added once.
    for b in range(Bt):
        xb = x_ref[b]                                             # (T, E) bf16
        qkv = jnp.dot(xb, wqkv_ref[...],
                      preferred_element_type=jnp.float32)         # (T, 3E) f32
        qkv = (qkv + bqkv_ref[...]).astype(jnp.bfloat16)          # (T, 3E) bf16
        # Split heads once into head-major scratch (static slices).
        for h in range(H):
            g = b * H + h
            q_scr[g] = qkv[:, h * D:(h + 1) * D]
            k_scr[g] = qkv[:, E + h * D:E + (h + 1) * D]
            v_scr[g] = qkv[:, 2 * E + h * D:2 * E + (h + 1) * D]

    q = q_scr[...]                                                # (G, T, D) bf16
    k = k_scr[...]
    v = v_scr[...]

    # ---- Scores for all (sequence, head) pairs: one batched MXU matmul
    # contracting D (no transposes).
    s = jnp.einsum("gtd,gsd->gts", q, k,
                   preferred_element_type=jnp.float32)            # (G, T, T) f32

    # Causal mask (strictly causal: every row has >=1 unmasked key, so a large
    # finite negative is safe here).
    row = jax.lax.broadcasted_iota(jnp.int32, (T, T), 0)
    col = jax.lax.broadcasted_iota(jnp.int32, (T, T), 1)
    s = jnp.where((col <= row)[None, :, :], s, -1e30)

    # Softmax: statistics in f32; normalization deferred to after P@V so the
    # reciprocal multiply touches (G,T,D) rather than (G,T,T).
    m = jnp.max(s, axis=-1, keepdims=True)
    p = jnp.exp(s - m)                                            # (G, T, T) f32
    l = jnp.sum(p, axis=-1, keepdims=True)                        # (G, T, 1) f32

    # ---- O = P @ V, batched over (sequence, head); bf16 operands, f32 acc.
    o = jnp.einsum("gts,gsd->gtd", p.astype(jnp.bfloat16), v,
                   preferred_element_type=jnp.float32)            # (G, T, D) f32
    o = o * pl.reciprocal(l, approx=True)                         # EUP slot
    o = o.astype(jnp.bfloat16)

    # ---- Re-assemble heads into a lane-dense (Bt*T, E) slab (one relayout),
    # then a single full-depth output projection (K = E, N = E).
    for b in range(Bt):
        rows = slice(b * T, (b + 1) * T)
        for h in range(H):
            o_scr[rows, h * D:(h + 1) * D] = o[b * H + h]

    y = jnp.dot(o_scr[...], wout_ref[...],
                preferred_element_type=jnp.float32) + bout_ref[...]  # (Bt*T, E)
    for b in range(Bt):
        y_ref[b] = y[b * T:(b + 1) * T].astype(y_ref.dtype)


# --------------------------------------------------------------------------
# VMEM / tiling heuristics
# --------------------------------------------------------------------------
def _padded_bytes(shape, itemsize):
    """Bytes after Mosaic pads last dim to 128 lanes and 2nd-last to 8 sublanes."""
    s = list(shape)
    if len(s) >= 1:
        s[-1] = -(-s[-1] // 128) * 128
    if len(s) >= 2:
        s[-2] = -(-s[-2] // 8) * 8
    n = 1
    for d in s:
        n *= d
    return n * itemsize


def _pick_batch_block(B, T, E, H, D):
    """Sequences per grid step: amortize per-step overhead, keep >=2 steps for
    v7x's two TensorCores, and stay within a small per-step VMEM budget."""
    budget = 4 * 1024 * 1024
    per_seq = (4 * _padded_bytes((T, E), 2)
               + 3 * _padded_bytes((H, T, D), 2)
               + 2 * _padded_bytes((H, T, T), 4))
    bt = 1
    for cand in range(1, B + 1):
        if B % cand:
            continue
        if cand * per_seq > budget:
            break
        if B >= 2 and B // cand < 2:      # keep 2 parallel grid steps
            break
        bt = cand
    return bt


def _vmem_limit_bytes(Bt, T, E, H, D):
    """Padding-aware footprint estimate, capped at 48 MiB for v7x headroom."""
    w = (_padded_bytes((E, 3 * E), 2) + _padded_bytes((E, E), 2)
         + _padded_bytes((1, 3 * E), 4) + _padded_bytes((1, E), 4))
    io = 2 * 2 * _padded_bytes((Bt, T, E), 2)            # in + out, double-buffered
    scr = 3 * _padded_bytes((Bt * H, T, D), 2) + _padded_bytes((Bt * T, E), 2)
    interm = (2 * _padded_bytes((Bt * H, T, T), 4)
              + _padded_bytes((T, 3 * E), 4)
              + _padded_bytes((Bt * T, E), 4))
    est = w + io + scr + interm
    return int(min(48 * 1024 * 1024, max(32 * 1024 * 1024, 2 * est)))


# --------------------------------------------------------------------------
# Wrapper
# --------------------------------------------------------------------------
def causal_self_attention(x, wqkv, bqkv, wout, bout, *, n_heads,
                          batch_block=None):
    """x: (B, T, E) f32. wqkv: (3E, E), bqkv: (3E,), wout: (E, E), bout: (E,).

    Weights follow the nn.Linear (out, in) convention; they are re-laid-out
    once here (pure layout plumbing done by XLA) into x @ W form with the
    1/sqrt(d_head) attention scale folded into the Q columns.  Returns bf16.
    """
    B, T, E = x.shape
    H = n_heads
    assert E % H == 0
    D = E // H
    scale = 1.0 / math.sqrt(D)

    # (3E, E) -> (E, 3E) with scale folded into the Q columns / bias.
    col_scale = jnp.concatenate(
        [jnp.full((E,), scale, jnp.float32), jnp.ones((2 * E,), jnp.float32)])
    wqkv_x = (wqkv.astype(jnp.float32).T * col_scale[None, :]).astype(jnp.bfloat16)
    bqkv_x = (bqkv.astype(jnp.float32) * col_scale).reshape(1, 3 * E)
    # (E, E) -> (E, E) x@W form.
    wout_x = wout.astype(jnp.float32).T.astype(jnp.bfloat16)
    bout_x = bout.reshape(1, E).astype(jnp.float32)
    x_bf = x.astype(jnp.bfloat16)

    Bt = batch_block or _pick_batch_block(B, T, E, H, D)
    assert B % Bt == 0, f"batch {B} not divisible by batch_block {Bt}"
    grid = (B // Bt,)

    kernel = functools.partial(_attn_kernel, n_heads=H, d_head=D)

    return pl.pallas_call(
        kernel,
        out_shape=jax.ShapeDtypeStruct((B, T, E), jnp.bfloat16),
        grid_spec=pltpu.PrefetchScalarGridSpec(
            num_scalar_prefetch=0,
            grid=grid,
            in_specs=[
                # Activations: blocked over batch, pipelined.
                pl.BlockSpec((Bt, T, E), lambda i: (i, 0, 0)),
                # Grid-invariant weights/biases: whole-array VMEM residents,
                # single-buffered (no 2x VMEM for weights).
                pl.BlockSpec(memory_space=pltpu.MemorySpace.VMEM),  # Wqkv (E,3E)
                pl.BlockSpec(memory_space=pltpu.MemorySpace.VMEM),  # bqkv (1,3E)
                pl.BlockSpec(memory_space=pltpu.MemorySpace.VMEM),  # Wout (E,E)
                pl.BlockSpec(memory_space=pltpu.MemorySpace.VMEM),  # bout (1,E)
            ],
            out_specs=pl.BlockSpec((Bt, T, E), lambda i: (i, 0, 0)),
            scratch_shapes=[
                pltpu.VMEM((Bt * H, T, D), jnp.bfloat16),   # Q (head-major)
                pltpu.VMEM((Bt * H, T, D), jnp.bfloat16),   # K
                pltpu.VMEM((Bt * H, T, D), jnp.bfloat16),   # V
                pltpu.VMEM((Bt * T, E), jnp.bfloat16),      # O slab (lane-dense)
            ],
        ),
        compiler_params=pltpu.CompilerParams(
            dimension_semantics=("parallel",),
            vmem_limit_bytes=_vmem_limit_bytes(Bt, T, E, H, D),
        ),
    )(x_bf, wqkv_x, bqkv_x, wout_x, bout_x)


# --------------------------------------------------------------------------
# Reference + self-test
# --------------------------------------------------------------------------
def _reference(x, wqkv, bqkv, wout, bout, n_heads):
    B, T, E = x.shape
    d_head = E // n_heads
    qkv = jnp.einsum("bte,fe->btf", x, wqkv) + bqkv
    q, k, v = jnp.split(qkv, 3, axis=-1)

    def split_heads(z):
        return z.reshape(B, T, n_heads, d_head).transpose(0, 2, 1, 3)

    q, k, v = map(split_heads, (q, k, v))
    s = jnp.einsum("bhtd,bhsd->bhts", q, k) / math.sqrt(d_head)
    mask = jnp.tril(jnp.ones((T, T), dtype=bool))
    s = jnp.where(mask, s, -jnp.inf)
    p = jax.nn.softmax(s, axis=-1)
    o = jnp.einsum("bhts,bhsd->bhtd", p, v)
    o = o.transpose(0, 2, 1, 3).reshape(B, T, E)
    return jnp.einsum("bte,fe->btf", o, wout) + bout


if __name__ == "__main__":
    B, T, E, n_heads = 4, 8, 32, 4

    key = jax.random.PRNGKey(0)
    kx, kw1, kb1, kw2, kb2 = jax.random.split(key, 5)

    x = jax.random.normal(kx, (B, T, E), dtype=jnp.float32)
    lim1 = 1.0 / math.sqrt(E)
    wqkv = jax.random.uniform(kw1, (3 * E, E), minval=-lim1, maxval=lim1,
                              dtype=jnp.float32)
    bqkv = jax.random.uniform(kb1, (3 * E,), minval=-lim1, maxval=lim1,
                              dtype=jnp.float32)
    wout = jax.random.uniform(kw2, (E, E), minval=-lim1, maxval=lim1,
                              dtype=jnp.float32)
    bout = jax.random.uniform(kb2, (E,), minval=-lim1, maxval=lim1,
                              dtype=jnp.float32)

    y = causal_self_attention(x, wqkv, bqkv, wout, bout, n_heads=n_heads)
    y = jax.block_until_ready(y)

    y_ref = _reference(x, wqkv, bqkv, wout, bout, n_heads)
    assert y.shape == (B, T, E)
    y_f32 = y.astype(jnp.float32)
    # Tolerance reflects bf16 matmul operands + bf16 output (f32 accumulation,
    # f32 softmax stats, approx EUP reciprocal).
    assert jnp.allclose(y_f32, y_ref, atol=5e-2, rtol=5e-2), \
        f"max abs err {jnp.max(jnp.abs(y_f32 - y_ref))}"

    print("KERNEL_OK")
</pallas_src>

<mosaic_0001>
module attributes {stable_mosaic.version = 11 : i64} {
  func.func @_attn_kernel(%arg0: i32, %arg1: memref<2x8x32xbf16, #tpu.memory_space<vmem>>, %arg2: memref<32x96xbf16, #tpu.memory_space<vmem>>, %arg3: memref<1x96xf32, #tpu.memory_space<vmem>>, %arg4: memref<32x32xbf16, #tpu.memory_space<vmem>>, %arg5: memref<1x32xf32, #tpu.memory_space<vmem>>, %arg6: memref<2x8x32xbf16, #tpu.memory_space<vmem>>, %arg7: memref<8x8x8xbf16, #tpu.memory_space<vmem>>, %arg8: memref<8x8x8xbf16, #tpu.memory_space<vmem>>, %arg9: memref<8x8x8xbf16, #tpu.memory_space<vmem>>, %arg10: memref<16x32xbf16, #tpu.memory_space<vmem>>) attributes {dimension_semantics = [#tpu.dimension_semantics<parallel>], iteration_bounds = array<i64: 2>, scalar_prefetch = 0 : i64, scratch_operands = 4 : i64, tpu.core_type = #tpu.core_type<tc>, window_params = [{transform_indices = @transform_0, window_bounds = array<i64: 2, 8, 32>}, {pipeline_mode = #tpu.pipeline_mode<synchronous>, transform_indices = @transform_1, window_bounds = array<i64: 32, 96>}, {pipeline_mode = #tpu.pipeline_mode<synchronous>, transform_indices = @transform_2, window_bounds = array<i64: 1, 96>}, {pipeline_mode = #tpu.pipeline_mode<synchronous>, transform_indices = @transform_3, window_bounds = array<i64: 32, 32>}, {pipeline_mode = #tpu.pipeline_mode<synchronous>, transform_indices = @transform_4, window_bounds = array<i64: 1, 32>}, {transform_indices = @transform_5, window_bounds = array<i64: 2, 8, 32>}]} {
    %c0 = arith.constant 0 : index
    %c0_0 = arith.constant 0 : index
    %c0_1 = arith.constant 0 : index
    %0 = vector.load %arg1[%c0, %c0_0, %c0_1] : memref<2x8x32xbf16, #tpu.memory_space<vmem>>, vector<1x8x32xbf16>
    %1 = vector.shape_cast %0 : vector<1x8x32xbf16> to vector<8x32xbf16>
    %c0_2 = arith.constant 0 : index
    %c0_3 = arith.constant 0 : index
    %2 = vector.load %arg2[%c0_2, %c0_3] : memref<32x96xbf16, #tpu.memory_space<vmem>>, vector<32x96xbf16>
    %cst = arith.constant dense<0.000000e+00> : vector<8x96xf32>
    %3 = tpu.matmul %1, %2, %cst {dimension_numbers = #tpu.dot_dimension_numbers<[1], [0], [0], [1], [0, 0, 1, 1], [], []>} : vector<8x32xbf16>, vector<32x96xbf16>, vector<8x96xf32> -> vector<8x96xf32>
    %c0_4 = arith.constant 0 : index
    %c0_5 = arith.constant 0 : index
    %4 = vector.load %arg3[%c0_4, %c0_5] : memref<1x96xf32, #tpu.memory_space<vmem>>, vector<1x96xf32>
    %5 = vector.broadcast %4 : vector<1x96xf32> to vector<8x96xf32>
    %6 = arith.addf %3, %5 : vector<8x96xf32>
    %7 = arith.truncf %6 : vector<8x96xf32> to vector<8x96xbf16>
    %8 = vector.extract_strided_slice %7 {offsets = [0, 0], sizes = [8, 8], strides = [1, 1]} : vector<8x96xbf16> to vector<8x8xbf16>
    %c0_6 = arith.constant 0 : index
    %c0_7 = arith.constant 0 : index
    %c0_8 = arith.constant 0 : index
    %9 = vector.load %arg7[%c0_6, %c0_7, %c0_8] : memref<8x8x8xbf16, #tpu.memory_space<vmem>>, vector<1x8x8xbf16>
    %10 = vector.shape_cast %9 : vector<1x8x8xbf16> to vector<8x8xbf16>
    %11 = vector.shape_cast %8 : vector<8x8xbf16> to vector<1x8x8xbf16>
    tpu.vector_store %arg7[%c0_6, %c0_7, %c0_8], %11 {strides = array<i32>} : memref<8x8x8xbf16, #tpu.memory_space<vmem>>, vector<1x8x8xbf16>,
    %12 = vector.extract_strided_slice %7 {offsets = [0, 32], sizes = [8, 8], strides = [1, 1]} : vector<8x96xbf16> to vector<8x8xbf16>
    %c0_9 = arith.constant 0 : index
    %c0_10 = arith.constant 0 : index
    %c0_11 = arith.constant 0 : index
    %13 = vector.load %arg8[%c0_9, %c0_10, %c0_11] : memref<8x8x8xbf16, #tpu.memory_space<vmem>>, vector<1x8x8xbf16>
    %14 = vector.shape_cast %13 : vector<1x8x8xbf16> to vector<8x8xbf16>
    %15 = vector.shape_cast %12 : vector<8x8xbf16> to vector<1x8x8xbf16>
    tpu.vector_store %arg8[%c0_9, %c0_10, %c0_11], %15 {strides = array<i32>} : memref<8x8x8xbf16, #tpu.memory_space<vmem>>, vector<1x8x8xbf16>,
    %16 = vector.extract_strided_slice %7 {offsets = [0, 64], sizes = [8, 8], strides = [1, 1]} : vector<8x96xbf16> to vector<8x8xbf16>
    %c0_12 = arith.constant 0 : index
    %c0_13 = arith.constant 0 : index
    %c0_14 = arith.constant 0 : index
    %17 = vector.load %arg9[%c0_12, %c0_13, %c0_14] : memref<8x8x8xbf16, #tpu.memory_space<vmem>>, vector<1x8x8xbf16>
    %18 = vector.shape_cast %17 : vector<1x8x8xbf16> to vector<8x8xbf16>
    %19 = vector.shape_cast %16 : vector<8x8xbf16> to vector<1x8x8xbf16>
    tpu.vector_store %arg9[%c0_12, %c0_13, %c0_14], %19 {strides = array<i32>} : memref<8x8x8xbf16, #tpu.memory_space<vmem>>, vector<1x8x8xbf16>,
    %20 = vector.extract_strided_slice %7 {offsets = [0, 8], sizes = [8, 8], strides = [1, 1]} : vector<8x96xbf16> to vector<8x8xbf16>
    %c1 = arith.constant 1 : index
    %c0_15 = arith.constant 0 : index
    %c0_16 = arith.constant 0 : index
    %21 = vector.load %arg7[%c1, %c0_15, %c0_16] : memref<8x8x8xbf16, #tpu.memory_space<vmem>>, vector<1x8x8xbf16>
    %22 = vector.shape_cast %21 : vector<1x8x8xbf16> to vector<8x8xbf16>
    %23 = vector.shape_cast %20 : vector<8x8xbf16> to vector<1x8x8xbf16>
    tpu.vector_store %arg7[%c1, %c0_15, %c0_16], %23 {strides = array<i32>} : memref<8x8x8xbf16, #tpu.memory_space<vmem>>, vector<1x8x8xbf16>,
    %24 = vector.extract_strided_slice %7 {offsets = [0, 40], sizes = [8, 8], strides = [1, 1]} : vector<8x96xbf16> to vector<8x8xbf16>
    %c1_17 = arith.constant 1 : index
    %c0_18 = arith.constant 0 : index
    %c0_19 = arith.constant 0 : index
    %25 = vector.load %arg8[%c1_17, %c0_18, %c0_19] : memref<8x8x8xbf16, #tpu.memory_space<vmem>>, vector<1x8x8xbf16>
    %26 = vector.shape_cast %25 : vector<1x8x8xbf16> to vector<8x8xbf16>
    %27 = vector.shape_cast %24 : vector<8x8xbf16> to vector<1x8x8xbf16>
    tpu.vector_store %arg8[%c1_17, %c0_18, %c0_19], %27 {strides = array<i32>} : memref<8x8x8xbf16, #tpu.memory_space<vmem>>, vector<1x8x8xbf16>,
    %28 = vector.extract_strided_slice %7 {offsets = [0, 72], sizes = [8, 8], strides = [1, 1]} : vector<8x96xbf16> to vector<8x8xbf16>
    %c1_20 = arith.constant 1 : index
    %c0_21 = arith.constant 0 : index
    %c0_22 = arith.constant 0 : index
    %29 = vector.load %arg9[%c1_20, %c0_21, %c0_22] : memref<8x8x8xbf16, #tpu.memory_space<vmem>>, vector<1x8x8xbf16>
    %30 = vector.shape_cast %29 : vector<1x8x8xbf16> to vector<8x8xbf16>
    %31 = vector.shape_cast %28 : vector<8x8xbf16> to vector<1x8x8xbf16>
    tpu.vector_store %arg9[%c1_20, %c0_21, %c0_22], %31 {strides = array<i32>} : memref<8x8x8xbf16, #tpu.memory_space<vmem>>, vector<1x8x8xbf16>,
    %32 = vector.extract_strided_slice %7 {offsets = [0, 16], sizes = [8, 8], strides = [1, 1]} : vector<8x96xbf16> to vector<8x8xbf16>
    %c2 = arith.constant 2 : index
    %c0_23 = arith.constant 0 : index
    %c0_24 = arith.constant 0 : index
    %33 = vector.load %arg7[%c2, %c0_23, %c0_24] : memref<8x8x8xbf16, #tpu.memory_space<vmem>>, vector<1x8x8xbf16>
    %34 = vector.shape_cast %33 : vector<1x8x8xbf16> to vector<8x8xbf16>
    %35 = vector.shape_cast %32 : vector<8x8xbf16> to vector<1x8x8xbf16>
    tpu.vector_store %arg7[%c2, %c0_23, %c0_24], %35 {strides = array<i32>} : memref<8x8x8xbf16, #tpu.memory_space<vmem>>, vector<1x8x8xbf16>,
    %36 = vector.extract_strided_slice %7 {offsets = [0, 48], sizes = [8, 8], strides = [1, 1]} : vector<8x96xbf16> to vector<8x8xbf16>
    %c2_25 = arith.constant 2 : index
    %c0_26 = arith.constant 0 : index
    %c0_27 = arith.constant 0 : index
    %37 = vector.load %arg8[%c2_25, %c0_26, %c0_27] : memref<8x8x8xbf16, #tpu.memory_space<vmem>>, vector<1x8x8xbf16>
    %38 = vector.shape_cast %37 : vector<1x8x8xbf16> to vector<8x8xbf16>
    %39 = vector.shape_cast %36 : vector<8x8xbf16> to vector<1x8x8xbf16>
    tpu.vector_store %arg8[%c2_25, %c0_26, %c0_27], %39 {strides = array<i32>} : memref<8x8x8xbf16, #tpu.memory_space<vmem>>, vector<1x8x8xbf16>,
    %40 = vector.extract_strided_slice %7 {offsets = [0, 80], sizes = [8, 8], strides = [1, 1]} : vector<8x96xbf16> to vector<8x8xbf16>
    %c2_28 = arith.constant 2 : index
    %c0_29 = arith.constant 0 : index
    %c0_30 = arith.constant 0 : index
    %41 = vector.load %arg9[%c2_28, %c0_29, %c0_30] : memref<8x8x8xbf16, #tpu.memory_space<vmem>>, vector<1x8x8xbf16>
    %42 = vector.shape_cast %41 : vector<1x8x8xbf16> to vector<8x8xbf16>
    %43 = vector.shape_cast %40 : vector<8x8xbf16> to vector<1x8x8xbf16>
    tpu.vector_store %arg9[%c2_28, %c0_29, %c0_30], %43 {strides = array<i32>} : memref<8x8x8xbf16, #tpu.memory_space<vmem>>, vector<1x8x8xbf16>,
    %44 = vector.extract_strided_slice %7 {offsets = [0, 24], sizes = [8, 8], strides = [1, 1]} : vector<8x96xbf16> to vector<8x8xbf16>
    %c3 = arith.constant 3 : index
    %c0_31 = arith.constant 0 : index
    %c0_32 = arith.constant 0 : index
    %45 = vector.load %arg7[%c3, %c0_31, %c0_32] : memref<8x8x8xbf16, #tpu.memory_space<vmem>>, vector<1x8x8xbf16>
    %46 = vector.shape_cast %45 : vector<1x8x8xbf16> to vector<8x8xbf16>
    %47 = vector.shape_cast %44 : vector<8x8xbf16> to vector<1x8x8xbf16>
    tpu.vector_store %arg7[%c3, %c0_31, %c0_32], %47 {strides = array<i32>} : memref<8x8x8xbf16, #tpu.memory_space<vmem>>, vector<1x8x8xbf16>,
    %48 = vector.extract_strided_slice %7 {offsets = [0, 56], sizes = [8, 8], strides = [1, 1]} : vector<8x96xbf16> to vector<8x8xbf16>
    %c3_33 = arith.constant 3 : index
    %c0_34 = arith.constant 0 : index
    %c0_35 = arith.constant 0 : index
    %49 = vector.load %arg8[%c3_33, %c0_34, %c0_35] : memref<8x8x8xbf16, #tpu.memory_space<vmem>>, vector<1x8x8xbf16>
    %50 = vector.shape_cast %49 : vector<1x8x8xbf16> to vector<8x8xbf16>
    %51 = vector.shape_cast %48 : vector<8x8xbf16> to vector<1x8x8xbf16>
    tpu.vector_store %arg8[%c3_33, %c0_34, %c0_35], %51 {strides = array<i32>} : memref<8x8x8xbf16, #tpu.memory_space<vmem>>, vector<1x8x8xbf16>,
    %52 = vector.extract_strided_slice %7 {offsets = [0, 88], sizes = [8, 8], strides = [1, 1]} : vector<8x96xbf16> to vector<8x8xbf16>
    %c3_36 = arith.constant 3 : index
    %c0_37 = arith.constant 0 : index
    %c0_38 = arith.constant 0 : index
    %53 = vector.load %arg9[%c3_36, %c0_37, %c0_38] : memref<8x8x8xbf16, #tpu.memory_space<vmem>>, vector<1x8x8xbf16>
    %54 = vector.shape_cast %53 : vector<1x8x8xbf16> to vector<8x8xbf16>
    %55 = vector.shape_cast %52 : vector<8x8xbf16> to vector<1x8x8xbf16>
    tpu.vector_store %arg9[%c3_36, %c0_37, %c0_38], %55 {strides = array<i32>} : memref<8x8x8xbf16, #tpu.memory_space<vmem>>, vector<1x8x8xbf16>,
    %c1_39 = arith.constant 1 : index
    %c0_40 = arith.constant 0 : index
    %c0_41 = arith.constant 0 : index
    %56 = vector.load %arg1[%c1_39, %c0_40, %c0_41] : memref<2x8x32xbf16, #tpu.memory_space<vmem>>, vector<1x8x32xbf16>
    %57 = vector.shape_cast %56 : vector<1x8x32xbf16> to vector<8x32xbf16>
    %c0_42 = arith.constant 0 : index
    %c0_43 = arith.constant 0 : index
    %58 = vector.load %arg2[%c0_42, %c0_43] : memref<32x96xbf16, #tpu.memory_space<vmem>>, vector<32x96xbf16>
    %cst_44 = arith.constant dense<0.000000e+00> : vector<8x96xf32>
    %59 = tpu.matmul %57, %58, %cst_44 {dimension_numbers = #tpu.dot_dimension_numbers<[1], [0], [0], [1], [0, 0, 1, 1], [], []>} : vector<8x32xbf16>, vector<32x96xbf16>, vector<8x96xf32> -> vector<8x96xf32>
    %c0_45 = arith.constant 0 : index
    %c0_46 = arith.constant 0 : index
    %60 = vector.load %arg3[%c0_45, %c0_46] : memref<1x96xf32, #tpu.memory_space<vmem>>, vector<1x96xf32>
    %61 = vector.broadcast %60 : vector<1x96xf32> to vector<8x96xf32>
    %62 = arith.addf %59, %61 : vector<8x96xf32>
    %63 = arith.truncf %62 : vector<8x96xf32> to vector<8x96xbf16>
    %64 = vector.extract_strided_slice %63 {offsets = [0, 0], sizes = [8, 8], strides = [1, 1]} : vector<8x96xbf16> to vector<8x8xbf16>
    %c4 = arith.constant 4 : index
    %c0_47 = arith.constant 0 : index
    %c0_48 = arith.constant 0 : index
    %65 = vector.load %arg7[%c4, %c0_47, %c0_48] : memref<8x8x8xbf16, #tpu.memory_space<vmem>>, vector<1x8x8xbf16>
    %66 = vector.shape_cast %65 : vector<1x8x8xbf16> to vector<8x8xbf16>
    %67 = vector.shape_cast %64 : vector<8x8xbf16> to vector<1x8x8xbf16>
    tpu.vector_store %arg7[%c4, %c0_47, %c0_48], %67 {strides = array<i32>} : memref<8x8x8xbf16, #tpu.memory_space<vmem>>, vector<1x8x8xbf16>,
    %68 = vector.extract_strided_slice %63 {offsets = [0, 32], sizes = [8, 8], strides = [1, 1]} : vector<8x96xbf16> to vector<8x8xbf16>
    %c4_49 = arith.constant 4 : index
    %c0_50 = arith.constant 0 : index
    %c0_51 = arith.constant 0 : index
    %69 = vector.load %arg8[%c4_49, %c0_50, %c0_51] : memref<8x8x8xbf16, #tpu.memory_space<vmem>>, vector<1x8x8xbf16>
    %70 = vector.shape_cast %69 : vector<1x8x8xbf16> to vector<8x8xbf16>
    %71 = vector.shape_cast %68 : vector<8x8xbf16> to vector<1x8x8xbf16>
    tpu.vector_store %arg8[%c4_49, %c0_50, %c0_51], %71 {strides = array<i32>} : memref<8x8x8xbf16, #tpu.memory_space<vmem>>, vector<1x8x8xbf16>,
    %72 = vector.extract_strided_slice %63 {offsets = [0, 64], sizes = [8, 8], strides = [1, 1]} : vector<8x96xbf16> to vector<8x8xbf16>
    %c4_52 = arith.constant 4 : index
    %c0_53 = arith.constant 0 : index
    %c0_54 = arith.constant 0 : index
    %73 = vector.load %arg9[%c4_52, %c0_53, %c0_54] : memref<8x8x8xbf16, #tpu.memory_space<vmem>>, vector<1x8x8xbf16>
    %74 = vector.shape_cast %73 : vector<1x8x8xbf16> to vector<8x8xbf16>
    %75 = vector.shape_cast %72 : vector<8x8xbf16> to vector<1x8x8xbf16>
    tpu.vector_store %arg9[%c4_52, %c0_53, %c0_54], %75 {strides = array<i32>} : memref<8x8x8xbf16, #tpu.memory_space<vmem>>, vector<1x8x8xbf16>,
    %76 = vector.extract_strided_slice %63 {offsets = [0, 8], sizes = [8, 8], strides = [1, 1]} : vector<8x96xbf16> to vector<8x8xbf16>
    %c5 = arith.constant 5 : index
    %c0_55 = arith.constant 0 : index
    %c0_56 = arith.constant 0 : index
    %77 = vector.load %arg7[%c5, %c0_55, %c0_56] : memref<8x8x8xbf16, #tpu.memory_space<vmem>>, vector<1x8x8xbf16>
    %78 = vector.shape_cast %77 : vector<1x8x8xbf16> to vector<8x8xbf16>
    %79 = vector.shape_cast %76 : vector<8x8xbf16> to vector<1x8x8xbf16>
    tpu.vector_store %arg7[%c5, %c0_55, %c0_56], %79 {strides = array<i32>} : memref<8x8x8xbf16, #tpu.memory_space<vmem>>, vector<1x8x8xbf16>,
    %80 = vector.extract_strided_slice %63 {offsets = [0, 40], sizes = [8, 8], strides = [1, 1]} : vector<8x96xbf16> to vector<8x8xbf16>
    %c5_57 = arith.constant 5 : index
    %c0_58 = arith.constant 0 : index
    %c0_59 = arith.constant 0 : index
    %81 = vector.load %arg8[%c5_57, %c0_58, %c0_59] : memref<8x8x8xbf16, #tpu.memory_space<vmem>>, vector<1x8x8xbf16>
    %82 = vector.shape_cast %81 : vector<1x8x8xbf16> to vector<8x8xbf16>
    %83 = vector.shape_cast %80 : vector<8x8xbf16> to vector<1x8x8xbf16>
    tpu.vector_store %arg8[%c5_57, %c0_58, %c0_59], %83 {strides = array<i32>} : memref<8x8x8xbf16, #tpu.memory_space<vmem>>, vector<1x8x8xbf16>,
    %84 = vector.extract_strided_slice %63 {offsets = [0, 72], sizes = [8, 8], strides = [1, 1]} : vector<8x96xbf16> to vector<8x8xbf16>
    %c5_60 = arith.constant 5 : index
    %c0_61 = arith.constant 0 : index
    %c0_62 = arith.constant 0 : index
    %85 = vector.load %arg9[%c5_60, %c0_61, %c0_62] : memref<8x8x8xbf16, #tpu.memory_space<vmem>>, vector<1x8x8xbf16>
    %86 = vector.shape_cast %85 : vector<1x8x8xbf16> to vector<8x8xbf16>
    %87 = vector.shape_cast %84 : vector<8x8xbf16> to vector<1x8x8xbf16>
    tpu.vector_store %arg9[%c5_60, %c0_61, %c0_62], %87 {strides = array<i32>} : memref<8x8x8xbf16, #tpu.memory_space<vmem>>, vector<1x8x8xbf16>,
    %88 = vector.extract_strided_slice %63 {offsets = [0, 16], sizes = [8, 8], strides = [1, 1]} : vector<8x96xbf16> to vector<8x8xbf16>
    %c6 = arith.constant 6 : index
    %c0_63 = arith.constant 0 : index
    %c0_64 = arith.constant 0 : index
    %89 = vector.load %arg7[%c6, %c0_63, %c0_64] : memref<8x8x8xbf16, #tpu.memory_space<vmem>>, vector<1x8x8xbf16>
    %90 = vector.shape_cast %89 : vector<1x8x8xbf16> to vector<8x8xbf16>
    %91 = vector.shape_cast %88 : vector<8x8xbf16> to vector<1x8x8xbf16>
    tpu.vector_store %arg7[%c6, %c0_63, %c0_64], %91 {strides = array<i32>} : memref<8x8x8xbf16, #tpu.memory_space<vmem>>, vector<1x8x8xbf16>,
    %92 = vector.extract_strided_slice %63 {offsets = [0, 48], sizes = [8, 8], strides = [1, 1]} : vector<8x96xbf16> to vector<8x8xbf16>
    %c6_65 = arith.constant 6 : index
    %c0_66 = arith.constant 0 : index
    %c0_67 = arith.constant 0 : index
    %93 = vector.load %arg8[%c6_65, %c0_66, %c0_67] : memref<8x8x8xbf16, #tpu.memory_space<vmem>>, vector<1x8x8xbf16>
    %94 = vector.shape_cast %93 : vector<1x8x8xbf16> to vector<8x8xbf16>
    %95 = vector.shape_cast %92 : vector<8x8xbf16> to vector<1x8x8xbf16>
    tpu.vector_store %arg8[%c6_65, %c0_66, %c0_67], %95 {strides = array<i32>} : memref<8x8x8xbf16, #tpu.memory_space<vmem>>, vector<1x8x8xbf16>,
    %96 = vector.extract_strided_slice %63 {offsets = [0, 80], sizes = [8, 8], strides = [1, 1]} : vector<8x96xbf16> to vector<8x8xbf16>
    %c6_68 = arith.constant 6 : index
    %c0_69 = arith.constant 0 : index
    %c0_70 = arith.constant 0 : index
    %97 = vector.load %arg9[%c6_68, %c0_69, %c0_70] : memref<8x8x8xbf16, #tpu.memory_space<vmem>>, vector<1x8x8xbf16>
    %98 = vector.shape_cast %97 : vector<1x8x8xbf16> to vector<8x8xbf16>
    %99 = vector.shape_cast %96 : vector<8x8xbf16> to vector<1x8x8xbf16>
    tpu.vector_store %arg9[%c6_68, %c0_69, %c0_70], %99 {strides = array<i32>} : memref<8x8x8xbf16, #tpu.memory_space<vmem>>, vector<1x8x8xbf16>,
    %100 = vector.extract_strided_slice %63 {offsets = [0, 24], sizes = [8, 8], strides = [1, 1]} : vector<8x96xbf16> to vector<8x8xbf16>
    %c7 = arith.constant 7 : index
    %c0_71 = arith.constant 0 : index
    %c0_72 = arith.constant 0 : index
    %101 = vector.load %arg7[%c7, %c0_71, %c0_72] : memref<8x8x8xbf16, #tpu.memory_space<vmem>>, vector<1x8x8xbf16>
    %102 = vector.shape_cast %101 : vector<1x8x8xbf16> to vector<8x8xbf16>
    %103 = vector.shape_cast %100 : vector<8x8xbf16> to vector<1x8x8xbf16>
    tpu.vector_store %arg7[%c7, %c0_71, %c0_72], %103 {strides = array<i32>} : memref<8x8x8xbf16, #tpu.memory_space<vmem>>, vector<1x8x8xbf16>,
    %104 = vector.extract_strided_slice %63 {offsets = [0, 56], sizes = [8, 8], strides = [1, 1]} : vector<8x96xbf16> to vector<8x8xbf16>
    %c7_73 = arith.constant 7 : index
    %c0_74 = arith.constant 0 : index
    %c0_75 = arith.constant 0 : index
    %105 = vector.load %arg8[%c7_73, %c0_74, %c0_75] : memref<8x8x8xbf16, #tpu.memory_space<vmem>>, vector<1x8x8xbf16>
    %106 = vector.shape_cast %105 : vector<1x8x8xbf16> to vector<8x8xbf16>
    %107 = vector.shape_cast %104 : vector<8x8xbf16> to vector<1x8x8xbf16>
    tpu.vector_store %arg8[%c7_73, %c0_74, %c0_75], %107 {strides = array<i32>} : memref<8x8x8xbf16, #tpu.memory_space<vmem>>, vector<1x8x8xbf16>,
    %108 = vector.extract_strided_slice %63 {offsets = [0, 88], sizes = [8, 8], strides = [1, 1]} : vector<8x96xbf16> to vector<8x8xbf16>
    %c7_76 = arith.constant 7 : index
    %c0_77 = arith.constant 0 : index
    %c0_78 = arith.constant 0 : index
    %109 = vector.load %arg9[%c7_76, %c0_77, %c0_78] : memref<8x8x8xbf16, #tpu.memory_space<vmem>>, vector<1x8x8xbf16>
    %110 = vector.shape_cast %109 : vector<1x8x8xbf16> to vector<8x8xbf16>
    %111 = vector.shape_cast %108 : vector<8x8xbf16> to vector<1x8x8xbf16>
    tpu.vector_store %arg9[%c7_76, %c0_77, %c0_78], %111 {strides = array<i32>} : memref<8x8x8xbf16, #tpu.memory_space<vmem>>, vector<1x8x8xbf16>,
    %c0_79 = arith.constant 0 : index
    %c0_80 = arith.constant 0 : index
    %c0_81 = arith.constant 0 : index
    %112 = vector.load %arg7[%c0_79, %c0_80, %c0_81] : memref<8x8x8xbf16, #tpu.memory_space<vmem>>, vector<8x8x8xbf16>
    %c0_82 = arith.constant 0 : index
    %c0_83 = arith.constant 0 : index
    %c0_84 = arith.constant 0 : index
    %113 = vector.load %arg8[%c0_82, %c0_83, %c0_84] : memref<8x8x8xbf16, #tpu.memory_space<vmem>>, vector<8x8x8xbf16>
    %c0_85 = arith.constant 0 : index
    %c0_86 = arith.constant 0 : index
    %c0_87 = arith.constant 0 : index
    %114 = vector.load %arg9[%c0_85, %c0_86, %c0_87] : memref<8x8x8xbf16, #tpu.memory_space<vmem>>, vector<8x8x8xbf16>
    "tpu.trace_start"() <{level = 10 : i32, message = "gtd,gsd->gts"}> : () -> ()
    %cst_88 = arith.constant dense<0.000000e+00> : vector<8x8x8xf32>
    %115 = tpu.matmul %112, %113, %cst_88 {dimension_numbers = #tpu.dot_dimension_numbers<[2], [2], [1], [1], [0, 0, 0, 1, 1, 1], [0], [0]>} : vector<8x8x8xbf16>, vector<8x8x8xbf16>, vector<8x8x8xf32> -> vector<8x8x8xf32>
    "tpu.trace_stop"() : () -> ()
    %116 = tpu.iota {dimensions = array<i32: 0>} : vector<8x8xi32>
    %117 = tpu.iota {dimensions = array<i32: 1>} : vector<8x8xi32>
    %118 = arith.cmpi sle, %117, %116 : vector<8x8xi32>
    %119 = vector.shape_cast %118 : vector<8x8xi1> to vector<1x8x8xi1>
    %cst_89 = arith.constant -1.000000e+30 : f32
    %120 = vector.shape_cast %119 : vector<1x8x8xi1> to vector<1x8x8xi1>
    %121 = vector.broadcast %120 : vector<1x8x8xi1> to vector<8x8x8xi1>
    %122 = vector.broadcast %cst_89 : f32 to vector<8x8x8xf32>
    %123 = arith.select %121, %115, %122 : vector<8x8x8xi1>, vector<8x8x8xf32>
    %cst_90 = arith.constant dense<0xFF800000> : vector<8x8xf32>
    %124 = vector.multi_reduction <maximumf>, %123, %cst_90 [2] : vector<8x8x8xf32> to vector<8x8xf32>
    %125 = vector.shape_cast %124 : vector<8x8xf32> to vector<8x8x1xf32>
    %126 = vector.broadcast %125 : vector<8x8x1xf32> to vector<8x8x8xf32>
    %127 = arith.subf %123, %126 : vector<8x8x8xf32>
    %128 = math.exp %127 : vector<8x8x8xf32>
    %cst_91 = arith.constant dense<0.000000e+00> : vector<8x8xf32>
    %129 = vector.multi_reduction <add>, %128, %cst_91 [2] : vector<8x8x8xf32> to vector<8x8xf32>
    %130 = vector.shape_cast %129 : vector<8x8xf32> to vector<8x8x1xf32>
    %131 = arith.truncf %128 : vector<8x8x8xf32> to vector<8x8x8xbf16>
    "tpu.trace_start"() <{level = 10 : i32, message = "gts,gsd->gtd"}> : () -> ()
    %cst_92 = arith.constant dense<0.000000e+00> : vector<8x8x8xf32>
    %132 = tpu.matmul %131, %114, %cst_92 {dimension_numbers = #tpu.dot_dimension_numbers<[2], [1], [1], [2], [0, 0, 0, 1, 1, 2], [0], [0]>} : vector<8x8x8xbf16>, vector<8x8x8xbf16>, vector<8x8x8xf32> -> vector<8x8x8xf32>
    "tpu.trace_stop"() : () -> ()
    %133 = tpu.reciprocal %130 {approx = true} : vector<8x8x1xf32> -> vector<8x8x1xf32>
    %134 = vector.broadcast %133 : vector<8x8x1xf32> to vector<8x8x8xf32>
    %135 = arith.mulf %132, %134 : vector<8x8x8xf32>
    %136 = arith.truncf %135 : vector<8x8x8xf32> to vector<8x8x8xbf16>
    %137 = vector.extract_strided_slice %136 {offsets = [0, 0, 0], sizes = [1, 8, 8], strides = [1, 1, 1]} : vector<8x8x8xbf16> to vector<1x8x8xbf16>
    %138 = vector.shape_cast %137 : vector<1x8x8xbf16> to vector<8x8xbf16>
    %c0_93 = arith.constant 0 : index
    %c0_94 = arith.constant 0 : index
    %139 = vector.load %arg10[%c0_93, %c0_94] : memref<16x32xbf16, #tpu.memory_space<vmem>>, vector<8x8xbf16>
    tpu.vector_store %arg10[%c0_93, %c0_94], %138 {strides = array<i32>} : memref<16x32xbf16, #tpu.memory_space<vmem>>, vector<8x8xbf16>,
    %140 = vector.extract_strided_slice %136 {offsets = [1, 0, 0], sizes = [1, 8, 8], strides = [1, 1, 1]} : vector<8x8x8xbf16> to vector<1x8x8xbf16>
    %141 = vector.shape_cast %140 : vector<1x8x8xbf16> to vector<8x8xbf16>
    %c0_95 = arith.constant 0 : index
    %c8 = arith.constant 8 : index
    %142 = vector.load %arg10[%c0_95, %c8] : memref<16x32xbf16, #tpu.memory_space<vmem>>, vector<8x8xbf16>
    tpu.vector_store %arg10[%c0_95, %c8], %141 {strides = array<i32>} : memref<16x32xbf16, #tpu.memory_space<vmem>>, vector<8x8xbf16>,
    %143 = vector.extract_strided_slice %136 {offsets = [2, 0, 0], sizes = [1, 8, 8], strides = [1, 1, 1]} : vector<8x8x8xbf16> to vector<1x8x8xbf16>
    %144 = vector.shape_cast %143 : vector<1x8x8xbf16> to vector<8x8xbf16>
    %c0_96 = arith.constant 0 : index
    %c16 = arith.constant 16 : index
    %145 = vector.load %arg10[%c0_96, %c16] : memref<16x32xbf16, #tpu.memory_space<vmem>>, vector<8x8xbf16>
    tpu.vector_store %arg10[%c0_96, %c16], %144 {strides = array<i32>} : memref<16x32xbf16, #tpu.memory_space<vmem>>, vector<8x8xbf16>,
    %146 = vector.extract_strided_slice %136 {offsets = [3, 0, 0], sizes = [1, 8, 8], strides = [1, 1, 1]} : vector<8x8x8xbf16> to vector<1x8x8xbf16>
    %147 = vector.shape_cast %146 : vector<1x8x8xbf16> to vector<8x8xbf16>
    %c0_97 = arith.constant 0 : index
    %c24 = arith.constant 24 : index
    %148 = vector.load %arg10[%c0_97, %c24] : memref<16x32xbf16, #tpu.memory_space<vmem>>, vector<8x8xbf16>
    tpu.vector_store %arg10[%c0_97, %c24], %147 {strides = array<i32>} : memref<16x32xbf16, #tpu.memory_space<vmem>>, vector<8x8xbf16>,
    %149 = vector.extract_strided_slice %136 {offsets = [4, 0, 0], sizes = [1, 8, 8], strides = [1, 1, 1]} : vector<8x8x8xbf16> to vector<1x8x8xbf16>
    %150 = vector.shape_cast %149 : vector<1x8x8xbf16> to vector<8x8xbf16>
    %c8_98 = arith.constant 8 : index
    %c0_99 = arith.constant 0 : index
    %151 = vector.load %arg10[%c8_98, %c0_99] : memref<16x32xbf16, #tpu.memory_space<vmem>>, vector<8x8xbf16>
    tpu.vector_store %arg10[%c8_98, %c0_99], %150 {strides = array<i32>} : memref<16x32xbf16, #tpu.memory_space<vmem>>, vector<8x8xbf16>,
    %152 = vector.extract_strided_slice %136 {offsets = [5, 0, 0], sizes = [1, 8, 8], strides = [1, 1, 1]} : vector<8x8x8xbf16> to vector<1x8x8xbf16>
    %153 = vector.shape_cast %152 : vector<1x8x8xbf16> to vector<8x8xbf16>
    %c8_100 = arith.constant 8 : index
    %c8_101 = arith.constant 8 : index
    %154 = vector.load %arg10[%c8_100, %c8_101] : memref<16x32xbf16, #tpu.memory_space<vmem>>, vector<8x8xbf16>
    tpu.vector_store %arg10[%c8_100, %c8_101], %153 {strides = array<i32>} : memref<16x32xbf16, #tpu.memory_space<vmem>>, vector<8x8xbf16>,
    %155 = vector.extract_strided_slice %136 {offsets = [6, 0, 0], sizes = [1, 8, 8], strides = [1, 1, 1]} : vector<8x8x8xbf16> to vector<1x8x8xbf16>
    %156 = vector.shape_cast %155 : vector<1x8x8xbf16> to vector<8x8xbf16>
    %c8_102 = arith.constant 8 : index
    %c16_103 = arith.constant 16 : index
    %157 = vector.load %arg10[%c8_102, %c16_103] : memref<16x32xbf16, #tpu.memory_space<vmem>>, vector<8x8xbf16>
    tpu.vector_store %arg10[%c8_102, %c16_103], %156 {strides = array<i32>} : memref<16x32xbf16, #tpu.memory_space<vmem>>, vector<8x8xbf16>,
    %158 = vector.extract_strided_slice %136 {offsets = [7, 0, 0], sizes = [1, 8, 8], strides = [1, 1, 1]} : vector<8x8x8xbf16> to vector<1x8x8xbf16>
    %159 = vector.shape_cast %158 : vector<1x8x8xbf16> to vector<8x8xbf16>
    %c8_104 = arith.constant 8 : index
    %c24_105 = arith.constant 24 : index
    %160 = vector.load %arg10[%c8_104, %c24_105] : memref<16x32xbf16, #tpu.memory_space<vmem>>, vector<8x8xbf16>
    tpu.vector_store %arg10[%c8_104, %c24_105], %159 {strides = array<i32>} : memref<16x32xbf16, #tpu.memory_space<vmem>>, vector<8x8xbf16>,
    %c0_106 = arith.constant 0 : index
    %c0_107 = arith.constant 0 : index
    %161 = vector.load %arg10[%c0_106, %c0_107] : memref<16x32xbf16, #tpu.memory_space<vmem>>, vector<16x32xbf16>
    %c0_108 = arith.constant 0 : index
    %c0_109 = arith.constant 0 : index
    %162 = vector.load %arg4[%c0_108, %c0_109] : memref<32x32xbf16, #tpu.memory_space<vmem>>, vector<32x32xbf16>
    %cst_110 = arith.constant dense<0.000000e+00> : vector<16x32xf32>
    %163 = tpu.matmul %161, %162, %cst_110 {dimension_numbers = #tpu.dot_dimension_numbers<[1], [0], [0], [1], [0, 0, 1, 1], [], []>} : vector<16x32xbf16>, vector<32x32xbf16>, vector<16x32xf32> -> vector<16x32xf32>
    %c0_111 = arith.constant 0 : index
    %c0_112 = arith.constant 0 : index
    %164 = vector.load %arg5[%c0_111, %c0_112] : memref<1x32xf32, #tpu.memory_space<vmem>>, vector<1x32xf32>
    %165 = vector.broadcast %164 : vector<1x32xf32> to vector<16x32xf32>
    %166 = arith.addf %163, %165 : vector<16x32xf32>
    %167 = vector.extract_strided_slice %166 {offsets = [0, 0], sizes = [8, 32], strides = [1, 1]} : vector<16x32xf32> to vector<8x32xf32>
    %168 = arith.truncf %167 : vector<8x32xf32> to vector<8x32xbf16>
    %c0_113 = arith.constant 0 : index
    %c0_114 = arith.constant 0 : index
    %c0_115 = arith.constant 0 : index
    %169 = vector.load %arg6[%c0_113, %c0_114, %c0_115] : memref<2x8x32xbf16, #tpu.memory_space<vmem>>, vector<1x8x32xbf16>
    %170 = vector.shape_cast %169 : vector<1x8x32xbf16> to vector<8x32xbf16>
    %171 = vector.shape_cast %168 : vector<8x32xbf16> to vector<1x8x32xbf16>
    tpu.vector_store %arg6[%c0_113, %c0_114, %c0_115], %171 {strides = array<i32>} : memref<2x8x32xbf16, #tpu.memory_space<vmem>>, vector<1x8x32xbf16>,
    %172 = vector.extract_strided_slice %166 {offsets = [8, 0], sizes = [8, 32], strides = [1, 1]} : vector<16x32xf32> to vector<8x32xf32>
    %173 = arith.truncf %172 : vector<8x32xf32> to vector<8x32xbf16>
    %c1_116 = arith.constant 1 : index
    %c0_117 = arith.constant 0 : index
    %c0_118 = arith.constant 0 : index
    %174 = vector.load %arg6[%c1_116, %c0_117, %c0_118] : memref<2x8x32xbf16, #tpu.memory_space<vmem>>, vector<1x8x32xbf16>
    %175 = vector.shape_cast %174 : vector<1x8x32xbf16> to vector<8x32xbf16>
    %176 = vector.shape_cast %173 : vector<8x32xbf16> to vector<1x8x32xbf16>
    tpu.vector_store %arg6[%c1_116, %c0_117, %c0_118], %176 {strides = array<i32>} : memref<2x8x32xbf16, #tpu.memory_space<vmem>>, vector<1x8x32xbf16>,
    return
  }
  func.func @transform_0(%arg0: i32) -> (i32, i32, i32) {
    %c0_i32 = arith.constant 0 : i32
    %c0_i32_0 = arith.constant 0 : i32
    %c0_i32_1 = arith.constant 0 : i32
    return %arg0, %c0_i32, %c0_i32_0 : i32, i32, i32
  }
  func.func @transform_1(%arg0: i32) -> (i32, i32) {
    %c0_i32 = arith.constant 0 : i32
    %c0_i32_0 = arith.constant 0 : i32
    %c0_i32_1 = arith.constant 0 : i32
    return %c0_i32, %c0_i32_0 : i32, i32
  }
  func.func @transform_2(%arg0: i32) -> (i32, i32) {
    %c0_i32 = arith.constant 0 : i32
    %c0_i32_0 = arith.constant 0 : i32
    %c0_i32_1 = arith.constant 0 : i32
    return %c0_i32, %c0_i32_0 : i32, i32
  }
  func.func @transform_3(%arg0: i32) -> (i32, i32) {
    %c0_i32 = arith.constant 0 : i32
    %c0_i32_0 = arith.constant 0 : i32
    %c0_i32_1 = arith.constant 0 : i32
    return %c0_i32, %c0_i32_0 : i32, i32
  }
  func.func @transform_4(%arg0: i32) -> (i32, i32) {
    %c0_i32 = arith.constant 0 : i32
    %c0_i32_0 = arith.constant 0 : i32
    %c0_i32_1 = arith.constant 0 : i32
    return %c0_i32, %c0_i32_0 : i32, i32
  }
  func.func @transform_5(%arg0: i32) -> (i32, i32, i32) {
    %c0_i32 = arith.constant 0 : i32
    %c0_i32_0 = arith.constant 0 : i32
    %c0_i32_1 = arith.constant 0 : i32
    return %arg0, %c0_i32, %c0_i32_0 : i32, i32, i32
  }
}

</mosaic_0001>

<bundles_post_ra>
// kernel: tpu_custom_call.1
= control target key start
LH: loop header
LB: loop body
LE: loop exit
PB: predicated region body
PF: predicated region fallthrough
CT: control target
= control target key end

     0   :  { %10 = vsyncpa [#allocation7], 0  ;;  %s2635_s0 = inlined_call_operand.hbm [shape: bf16[4,8,32], index: 0, kind: input, shape index: {}]   ;;  %s2636_s1 = inlined_call_operand.hbm [shape: bf16[32,96], index: 1, kind: input, shape index: {}]   ;;  %s2637_s2 = inlined_call_operand.vmem [shape: f32[1,96], index: 2, kind: input, shape index: {}]   ;;  %s2638_s3 = inlined_call_operand.hbm [shape: bf16[32,32], index: 3, kind: input, shape index: {}]   ;;  %s2639_s4 = inlined_call_operand.vmem [shape: f32[1,32], index: 4, kind: input, shape index: {}]   ;;  %s2640_s5 = inlined_call_operand.hbm [shape: bf16[4,8,32], index: 5, kind: output, shape index: {}]  }
   0x1   :  { %12 = vsyncpa [#allocation7 + $0x1], 0 }
   0x2   :  { %13 = vsyncpa [#allocation10], 0 }
   0x3   :  { %14 = vsyncpa [#allocation8], 0 }
   0x4   :  { %16 = vsyncpa [#allocation8 + $0x1], 0  ;;  %s2187_s18 = smov 0   ;;  %s2189_s19 = smov 0  }
   0x5   :  { %s2191_s20 = smov 0   ;;  %s2193_s21 = smov 0  }
   0x6 LB: > { %s2208_s22 = sadd.s32 4294967295, %s2132_s21   ;;  %s1637_s23 = sadd.s32 4294967294, %s2132_s21   ;;  %s2132_s21 = sphi %s2193_s21, %s2662_s21   ;;  %s2128_s20 = sphi %s2191_s20, %s2661_s20   ;;  %s2124_s19 = sphi %s2189_s19, %s2660_s19   ;;  %s2120_s18 = sphi %s2187_s18, %s2659_s18  }
   0x7   : > { %p42_p0 = scmp.ne.s32.totalorder %s2124_s19, %s2120_s18  ;;  %p2641_p1 = scmp.eq.s32.totalorder %s2208_s22, 0 }
   0x8   : > { %p156_p3 = scmp.eq.s32.totalorder %s1637_s23, 1  ;;  %p1638_p5 = scmp.ge.s32.totalorder %s2132_s21, 1 }
   0x9   : > { %p2217_p4 = por %p2641_p1, %p42_p0  ;;  %p163_p7 = scmp.lt.s32.totalorder %s2132_s21, 3 }
   0xa   : > { %p2222_p6 = por %p156_p3, %p42_p0  ;;  %s2134_s27 = smov [#allocation9]  }
   0xb   : > { %s2644_s24 = scalar_select %p2217_p4, 1, 0 }
   0xc   : > { %s2645_s25 = scalar_select %p2222_p6, 1, 0 }
   0xd   : > { %p2227_p8 = pnand %p1638_p5, %p163_p7  ;;  %s175_s28 = sshll.u32 %s2134_s27, 4  ;;  %s2231_s28 = int_to_ptr.vmem [resolvable:$true] %s175_s28 }
   0xe   : > { %s2135_s30 = smov [#allocation11]   ;;  %s1976_s9 = scalar_lea.hbm %s2636_s1, 256 }
   0xf   : > { %p1864_p9 = pneg %p2227_p8  ;;  %s191_s6 = sshll.u32 %s2135_s30, 4  ;;  %s2242_s6 = int_to_ptr.vmem [resolvable:$true] %s191_s6 }
  0x10   : > { %p1977_p12 = scmp.ne.s32.totalorder %s2636_s1, %s1976_s9  ;;  %p1983_p5 = scmp.lt.u32.totalorder %s1976_s9, %s2636_s1 }
  0x11   : > { %p2238_p11 = pnand %p1864_p9, %p2641_p1 }
  0x13   : > { %p1978_p13 = pneg %p2238_p11 }
  0x15   : > { %p1979_p0 = pnand %p1978_p13, %p1977_p12 }
  0x17   : > { %p1980_p3 = pneg %p1979_p0 }
  0x19   : > { %p1985_p7 = pnand %p1983_p5, %p1980_p3 }
  0x1b   : > { %1988 = shalt.err (!%p1985_p7)
}
  0x1c   : > { %s1989_s14 = scalar_lea.vmem %s2231_s28, 256  ;;  %p1997_p2 = scmp.lt.s32.totalorder %s2231_s28, %s2231_s28 }
  0x1d   : > { %p1990_p9 = scmp.ne.s32.totalorder %s2231_s28, %s1989_s14  ;;  %p1998_p12 = scmp.lt.s32.totalorder %s1989_s14, %s1989_s14 }
  0x1f   : > { %p1992_p10 = pnand %p1990_p9, %p1978_p13  ;;  %p1999_p0 = por %p1998_p12, %p1997_p2 }
  0x21   : > { %p1993_p1 = pneg %p1992_p10 }
  0x23   : > { %p2000_p6 = pnand %p1999_p0, %p1993_p1 }
  0x25   : > { %2003 = shalt.err (!%p2000_p6)
}
  0x26   : > { %s2136_s15 = smov 64   ;;  %s2137_s16 = smov 4  }
  0x27   : > { %1867 = dma.hbm_to_vmem [thread:$0]  (!%p2238_p11), %s2636_s1, 256, %s2231_s28, [#allocation10], %s2136_s15, %s2136_s15, %s2137_s16  }
  0x28   : > { %s2004_s7 = scalar_lea.hbm %s2638_s3, 256 }
  0x29   : > { %p2005_p1 = scmp.ne.s32.totalorder %s2638_s3, %s2004_s7  ;;  %p2011_p10 = scmp.lt.u32.totalorder %s2004_s7, %s2638_s3 }
  0x2b   : > { %p2007_p2 = pnand %p2005_p1, %p1978_p13 }
  0x2d   : > { %p2008_p6 = pneg %p2007_p2 }
  0x2f   : > { %p2013_p3 = pnand %p2011_p10, %p2008_p6 }
  0x31   : > { %2016 = shalt.err (!%p2013_p3)
}
  0x32   : > { %s2017_s28 = scalar_lea.vmem %s2242_s6, 256  ;;  %p2025_p12 = scmp.lt.s32.totalorder %s2242_s6, %s2242_s6 }
  0x33   : > { %p2018_p5 = scmp.ne.s32.totalorder %s2242_s6, %s2017_s28  ;;  %p2026_p0 = scmp.lt.s32.totalorder %s2017_s28, %s2017_s28 }
  0x35   : > { %p2020_p7 = pnand %p2018_p5, %p1978_p13  ;;  %p2027_p1 = por %p2026_p0, %p2025_p12 }
  0x37   : > { %p2021_p9 = pneg %p2020_p7 }
  0x39   : > { %p2028_p2 = pnand %p2027_p1, %p2021_p9 }
  0x3b   : > { %2031 = shalt.err (!%p2028_p2)
}
  0x3c   : > { %1870 = dma.hbm_to_vmem [thread:$0]  (!%p2238_p11), %s2638_s3, 256, %s2242_s6, [#allocation10], %s2136_s15, %s2136_s15, %s2137_s16  }
  0x3d   : > { %s2303_s29 = sadd.s32 1, %s2132_s21   ;;  %s29_s14 = sadd.s32 1, %s2128_s20 }
  0x3e   : > { %s26_s17 = ssub.s32 %s2132_s21, %s2303_s29  ;;  %p36_p13 = scmp.ne.s32.totalorder %s2128_s20, %s2124_s19 }
  0x3f   : > { %p27_p6 = scmp.eq.s32.totalorder %s26_s17, 0  ;;  %p37_p10 = scmp.eq.s32.totalorder %s2132_s21, 0 }
  0x40   : > { %p2648_p3 = scmp.eq.s32.totalorder %s2208_s22, 1  ;;  %p1881_p7 = scmp.lt.s32.totalorder %s2132_s21, 2 }
  0x41   : > { %s2319_s27 = scalar_select %p27_p6, %s2128_s20, %s29_s14  }
  0x42   : > { %p2313_p5 = por %p2648_p3, %p36_p13  ;;  %p38_p9 = por %p37_p10, %p36_p13 }
  0x43   : > { %s208_s30 = sand.u32 1, %s2128_s20   ;;  %s1687_s6 = sshll.u32 %s2132_s21, 7 }
  0x44   : > { %s2649_s23 = scalar_select %p2313_p5, 1, 0 }
  0x45   : > { %s1642_s7 = sshll.u32 %s208_s30, 3  ;;  %s2326_s10 = scalar_lea.hbm %s2635_s0, %s1687_s6 }
  0x46   : > { %s212_s11 = scalar_lea.vmem [#allocation6], %s1642_s7  ;;  %p2330_p11 = pnand %p1881_p7, %p38_p9 }
  0x47   : > { %s219_s28 = sshll.u32 %s212_s11, 4  ;;  %s2334_s13 = scalar_lea.sflag [#allocation7], %s208_s30  ;;  %s2328_s28 = int_to_ptr.vmem [resolvable:$true] %s219_s28 }
  0x48   : > { %s2032_s14 = scalar_lea.hbm %s2326_s10, 128  ;;  %p2034_p0 = pneg %p2330_p11 }
  0x49   : > { %p2033_p12 = scmp.ne.s32.totalorder %s2326_s10, %s2032_s14  ;;  %s2037_s6 = scalar_lea.hbm %s2635_s0, 256 }
  0x4a   : > { %p2038_p13 = scmp.lt.u32.totalorder %s2326_s10, %s2635_s0  ;;  %p2039_p6 = scmp.lt.u32.totalorder %s2037_s6, %s2032_s14 }
  0x4b   : > { %p2035_p1 = pnand %p2034_p0, %p2033_p12  ;;  %p2041_p3 = scmp.lt.u32.totalorder %s2032_s14, %s2326_s10 }
  0x4c   : > { %p2040_p10 = por %p2039_p6, %p2038_p13 }
  0x4d   : > { %p2036_p2 = pneg %p2035_p1 }
  0x4e   : > { %p2042_p7 = por %p2041_p3, %p2040_p10 }
  0x50   : > { %p2043_p9 = pnand %p2042_p7, %p2036_p2 }
  0x52   : > { %2046 = shalt.err (!%p2043_p9)
}
  0x53   : > { %s2047_s30 = scalar_lea.vmem %s2328_s28, 128  ;;  %s2138_s11 = smov [#allocation6]  }
  0x54   : > { %p2048_p12 = scmp.ne.s32.totalorder %s2328_s28, %s2047_s30  ;;  %s2052_s17 = sshll.u32 %s2138_s11, 4  ;;  %s2053_s17 = int_to_ptr.vmem [resolvable:$false] %s2052_s17 }
  0x55   : > { %s2054_s7 = scalar_lea.vmem %s2053_s17, 256  ;;  %p2055_p4 = scmp.lt.s32.totalorder %s2328_s28, %s2053_s17 }
  0x56   : > { %p2050_p1 = pnand %p2048_p12, %p2034_p0  ;;  %p2056_p13 = scmp.lt.s32.totalorder %s2054_s7, %s2047_s30 }
  0x58   : > { %p2051_p5 = pneg %p2050_p1  ;;  %p2057_p6 = por %p2056_p13, %p2055_p4 }
  0x5a   : > { %p2058_p10 = pnand %p2057_p6, %p2051_p5 }
  0x5c   : > { %2061 = shalt.err (!%p2058_p10)
}
  0x5d   : > { %1874 = dma.hbm_to_vmem [thread:$0]  (!%p2330_p11), %s2326_s10, 128, %s2328_s28, %s2334_s13, %s2136_s15, %s2136_s15, %s2137_s16  }
  0x5e   : > { %231 = sbr.rel (%p2227_p8) target bundleno = 1440 (0x5a0), region = 40  ;;  %s2368_s14 = sand.u32 (!%p2227_p8), 1, %s2124_s19  }
  0x5f   : > { %s1646_s6 = sshll.u32 (!%p2227_p8), %s2368_s14, 3  ;;  %s234_s8 = scalar_lea.sflag (!%p2227_p8), [#allocation7], %s2368_s14 }
  0x60   : > { %s237_s12 = scalar_lea.vmem (!%p2227_p8), [#allocation6], %s1646_s6  ;;  %p2651_p4 = scmp.ne.s32.totalorder (!%p2227_p8), %s2644_s24, 0 }
  0x65   : > { %2107 = dma.done.wait (%p2651_p4), %s234_s8, 128  }
  0x66   : > { %2109 = vsyncadd (%p2651_p4), %s234_s8, 4294967168  ;;  %p2652_p5 = scmp.eq.s32.totalorder %s2208_s22, 0 }
  0x68   : > { %2111 = dma.done.wait (%p2652_p5), [#allocation10], 512   ;;  %p2653_p8 = pmov %p2652_p5 }
  0x69   : > { %v2139_v0 = vmov 0.0   ;;  %vm2140_vm0 = vmmov 0   ;;  %v1938_v1 = vld [vmem:[#allocation9] sm:$0xff]   ;;  %v1939_v2 = vld [vmem:[#allocation9 + $0x8] sm:$0xff]   ;;  %v275_v5 = vld [vmem:[%s237_s12] sm:$0xf] }
  0x6a   : > { %2113 = vsyncadd (%p2653_p8), [#allocation10], 4294966784  ;;  %1732 = vmatprep.subr.bf16.mxu0 %v2139_v0  ;;  %1736 = vmatprep.mubr.msk.bf16.mxu0 %vm2140_vm0, %v2139_v0  ;;  %v1940_v3 = vld [vmem:[#allocation9] sm:$0xff]   ;;  %v1941_v4 = vld [vmem:[#allocation9 + $0x8] sm:$0xff]   ;;  %vm299_vm1 = vcmask 261120   ;;  %vm344_vm2 = vcmask 60416  }
  0x6b   : > { %1740 = vmatprep.subr.bf16.mxu1 %v2139_v0  ;;  %1744 = vmatprep.mubr.msk.bf16.mxu1 %vm2140_vm0, %v2139_v0  ;;  %v1655_v6 = vld [vmem:[%s237_s12 + $0x4] sm:$0xf]  ;;  %v1650_v7 = vld [vmem:[%s2637_s2] ss:$0 sm:$0xff]  ;;  %s2141_s15 = smov 80   ;;  %s2142_s16 = smov 96  }
  0x6c   : > { %1733 = vmatpush3.bf16.msra.mxu0 %v1938_v1  ;;  %1741 = vmatpush3.bf16.msra.mxu1 %v1940_v3  ;;  %s2143_s10 = smov 120   ;;  %s2144_s28 = smov 88   ;;  %vm555_vm3 = vcmask 64512   ;;  %vm1022_vm4 = vcmask 1043456   ;;  %vm1434_vm6 = vcmask 64516   ;;  %vm1417_vm7 = vcmask 126016  }
  0x6d   : > { %1734 = vmatprep.subr.bf16.mxu0 %v2139_v0  ;;  %1742 = vmatprep.subr.bf16.mxu1 %v2139_v0  ;;  %s2145_s13 = smov 112   ;;  %s2146_s9 = smov 72   ;;  %vm1423_vm8 = vcmask 191616   ;;  %vm1441_vm9 = vcmask 130116   ;;  %vm1429_vm10 = vcmask 257216   ;;  %vm1448_vm11 = vcmask 195716  }
  0x6e   : > { %s2147_s30 = smov 104   ;;  %s2148_s11 = smov 64   ;;  %vm1455_vm12 = vcmask 261316   ;;  %vm1526_vm13 = vcmask 257024  }
  0x6f   : > { %s2149_s17 = smov 56   ;;  %s2150_s7 = smov 48  }
  0x70   : > { %1735 = vmatpush3.bf16.msra.mxu0 %v1939_v2  ;;  %1743 = vmatpush3.bf16.msra.mxu1 %v1941_v4  ;;  %s2151_s8 = smov 40   ;;  %s2152_s12 = smov 8  }
  0x71   : > { %1748 = vmatprep.subr.bf16.mxu0 %v2139_v0  ;;  %1754 = vmatprep.subr.bf16.mxu1 %v2139_v0  ;;  %s2153_s24 = smov 16   ;;  %s2154_s26 = smov 24  }
  0x72   : > { %p2656_p0 = scmp.ne.s32.totalorder %s2649_s23, 0 }
  0x73   : > { %1737 = vmatmul.mubr.msk.bf16.vlgmr.msra.gmra.mrb[0].mxu0 %vm299_vm1, %v275_v5  ;;  %1745 = vmatmul.mubr.msk.bf16.vlgmr.msra.gmra.mrb[0].mxu1 %vm299_vm1, %v1655_v6  ;;  %v924_v5 = vlaneseq }
  0x74   : > { %1750 = vmatprep.mubr.msk.bf16.mxu0 %vm2140_vm0, %v2139_v0  ;;  %1756 = vmatprep.mubr.msk.bf16.mxu1 %vm2140_vm0, %v2139_v0 }
  0x75   : > { %v925_v6 = vshrl.u32 %v924_v5, 7 }
 0x146   : > { %v337_v8 = vpop.f32.mrb[0].mxu0  ;;  %v464_v14 = vpop.f32.mrb[0].mxu1 }
 0x147   : > { %v338_v9 = vadd.f32 %v1650_v7, %v337_v8  ;;  %v1738_v10 = vpop.f32.mrb[1].mxu0  ;;  %v465_v15 = vadd.f32 %v1650_v7, %v464_v14  ;;  %v1746_v16 = vpop.f32.mrb[1].mxu1  ;;  %v927_v7 = vand.u32 127, %v924_v5 }
 0x148   : > { %v340_v11 = vpop.f32.mrb[2].mxu0  ;;  %v467_v17 = vpop.f32.mrb[2].mxu1 }
 0x149   : > { %v343_v12 = vpack.c.bf16 %v338_v9, %v338_v9  ;;  %v1739_v13 = vpop.f32.mrb[3].mxu0  ;;  %v2402_v18 = vpack.c.bf16 %v465_v15, %v465_v15  ;;  %v1747_v19 = vpop.f32.mrb[3].mxu1  ;;  %vm2483_vm5 = vcmp.le.s32.totalorder %v927_v7, %v925_v6 }
 0x14b   : > { %377 = vrot.lane.b32.xlu1 %v343_v12, %s2141_s15  ;;  %349 = vrot.lane.b32.xlu0 %v343_v12, %s2142_s16  ;;  %345 = vst.msk [vmem:[#allocation2] sm:$0xf] %vm344_vm2, %v343_v12  ;;  %472 = vst.msk [vmem:[#allocation2 + $0x10] sm:$0xf] %vm344_vm2, %v2402_v18 }
 0x14f   : > { %357 = vrot.lane.b32.xlu1 %v343_v12, %s2143_s10  ;;  %362 = vrot.lane.b32.xlu0 %v343_v12, %s2144_s28 }
 0x152   : > { %v531_v35 = vld [vmem:[#allocation2] sm:$0xf]  ;;  %v535_v55 = vld [vmem:[#allocation2 + $0x10] sm:$0xf] }
 0x153   : > { %372 = vrot.lane.b32.xlu1 %v343_v12, %s2145_s13  ;;  %392 = vrot.lane.b32.xlu0 %v343_v12, %s2146_s9 }
 0x157   : > { %387 = vrot.lane.b32.xlu1 %v343_v12, %s2147_s30  ;;  %476 = vrot.lane.b32.xlu0 %v2402_v18, %s2142_s16 }
 0x15b   : > { %506 = vrot.lane.b32.xlu1 %v2402_v18, %s2141_s15  ;;  %491 = vrot.lane.b32.xlu0 %v2402_v18, %s2144_s28  ;;  %s271_s28 = scalar_lea.vmem [#allocation12], %s1646_s6 }
 0x15f   : > { %521 = vrot.lane.b32.xlu1 %v2402_v18, %s2146_s9  ;;  %486 = vrot.lane.b32.xlu0 %v2402_v18, %s2143_s10  ;;  %s1690_s10 = sshll.u32 %s2208_s22, 7  ;;  %s1532_s22 = scalar_lea.sflag [#allocation8], %s2368_s14 }
 0x163   : > { %516 = vrot.lane.b32.xlu1 %v2402_v18, %s2147_s30  ;;  %501 = vrot.lane.b32.xlu0 %v2402_v18, %s2145_s13  ;;  %s1545_s13 = sshll.u32 %s271_s28, 4  ;;  %s2589_s13 = int_to_ptr.vmem [resolvable:$true] %s1545_s13 }
 0x164   : > { %s2062_s6 = scalar_lea.vmem %s2589_s13, 128 }
 0x165   : > { %p2063_p11 = scmp.ne.s32.totalorder %s2589_s13, %s2062_s6 }
 0x167   : > { %353 = vrot.lane.b32.xlu1 %v343_v12, %s2148_s11  ;;  %367 = vrot.lane.b32.xlu0 %v343_v12, %s2149_s17  ;;  %p2064_p2 = pnand %p2063_p11, %p2656_p0 }
 0x169   : > { %p2065_p3 = pneg %p2064_p2 }
 0x16b   : > { %382 = vrot.lane.b32.xlu1 %v343_v12, %s2150_s7  ;;  %397 = vrot.lane.b32.xlu0 %v343_v12, %s2151_s8 }
 0x16f   : > { %481 = vrot.lane.b32.xlu1 %v2402_v18, %s2148_s11 }
 0x173   : > { %496 = vrot.lane.b32.xlu1 %v2402_v18, %s2149_s17  ;;  %s2587_s17 = scalar_lea.hbm %s2640_s5, %s1690_s10 }
 0x1bd   : > { %v378_v20 = vpop.permute.xlu1 %377  ;;  %v350_v21 = vpop.permute.xlu0 %349 }
 0x1be   : > { %381 = vst.msk [vmem:[#allocation3 + $0x8] sm:$0xf] %vm344_vm2, %v378_v20  ;;  %352 = vst.msk [vmem:[#allocation3] sm:$0xf] %vm344_vm2, %v350_v21 }
 0x1c1   : > { %v358_v22 = vpop.permute.xlu1 %357  ;;  %v363_v23 = vpop.permute.xlu0 %362 }
 0x1c2   : > { %361 = vst.msk [vmem:[#allocation2 + $0x4] sm:$0xf] %vm344_vm2, %v358_v22  ;;  %366 = vst.msk [vmem:[#allocation3 + $0x4] sm:$0xf] %vm344_vm2, %v363_v23 }
 0x1c5   : > { %v373_v24 = vpop.permute.xlu1 %372  ;;  %v393_v25 = vpop.permute.xlu0 %392  ;;  %v539_v26 = vld [vmem:[#allocation3] sm:$0xf]  ;;  %v541_v32 = vld [vmem:[#allocation3 + $0x8] sm:$0xf] }
 0x1c6   : > { %376 = vst.msk [vmem:[#allocation2 + $0x8] sm:$0xf] %vm344_vm2, %v373_v24  ;;  %396 = vst.msk [vmem:[#allocation3 + $0xc] sm:$0xf] %vm344_vm2, %v393_v25  ;;  %v560_v27 = vsel %vm555_vm3, %v539_v26, 0  ;;  %v652_v36 = vsel %vm555_vm3, %v541_v32, 0 }
 0x1c7   : > { %1749 = vmatpush3.bf16.xpose.msra.mxu0 %v560_v27 }
 0x1c8   : > { %1760 = vmatprep.subr.bf16.mxu0 %v2139_v0 }
 0x1c9   : > { %v388_v28 = vpop.permute.xlu1 %387  ;;  %v477_v29 = vpop.permute.xlu0 %476  ;;  %v540_v30 = vld [vmem:[#allocation3 + $0x4] sm:$0xf] }
 0x1ca   : > { %391 = vst.msk [vmem:[#allocation2 + $0xc] sm:$0xf] %vm344_vm2, %v388_v28  ;;  %480 = vst.msk [vmem:[#allocation3 + $0x10] sm:$0xf] %vm344_vm2, %v477_v29  ;;  %v606_v31 = vsel %vm555_vm3, %v540_v30, 0 }
 0x1cb   : > { %1755 = vmatpush3.bf16.xpose.msra.mxu1 %v606_v31  ;;  %v532_v40 = vld [vmem:[#allocation2 + $0x4] sm:$0xf] }
 0x1cc   : > { %1766 = vmatprep.subr.bf16.mxu1 %v2139_v0 }
 0x1cd   : > { %v507_v33 = vpop.permute.xlu1 %506  ;;  %v492_v34 = vpop.permute.xlu0 %491  ;;  %v542_v37 = vld [vmem:[#allocation3 + $0xc] sm:$0xf]  ;;  %v533_v46 = vld [vmem:[#allocation2 + $0x8] sm:$0xf] }
 0x1ce   : > { %510 = vst.msk [vmem:[#allocation3 + $0x18] sm:$0xf] %vm344_vm2, %v507_v33  ;;  %495 = vst.msk [vmem:[#allocation3 + $0x14] sm:$0xf] %vm344_vm2, %v492_v34  ;;  %1751 = vmatmul.mubr.msk.bf16.vlgmr.msra.gmra.mrb[4].mxu0 %vm555_vm3, %v531_v35  ;;  %v698_v42 = vsel %vm555_vm3, %v542_v37, 0 }
 0x1cf   : > { %1761 = vmatpush3.bf16.xpose.msra.mxu0 %v652_v36  ;;  %1762 = vmatprep.mubr.msk.bf16.mxu0 %vm2140_vm0, %v2139_v0 }
 0x1d0   : > { %1772 = vmatprep.subr.bf16.mxu0 %v2139_v0 }
 0x1d1   : > { %v522_v38 = vpop.permute.xlu1 %521  ;;  %v487_v39 = vpop.permute.xlu0 %486  ;;  %v543_v41 = vld [vmem:[#allocation3 + $0x10] sm:$0xf]  ;;  %v534_v50 = vld [vmem:[#allocation2 + $0xc] sm:$0xf] }
 0x1d2   : > { %525 = vst.msk [vmem:[#allocation3 + $0x1c] sm:$0xf] %vm344_vm2, %v522_v38  ;;  %490 = vst.msk [vmem:[#allocation2 + $0x14] sm:$0xf] %vm344_vm2, %v487_v39  ;;  %1757 = vmatmul.mubr.msk.bf16.vlgmr.msra.gmra.mrb[4].mxu1 %vm555_vm3, %v532_v40  ;;  %v744_v43 = vsel %vm555_vm3, %v543_v41, 0 }
 0x1d3   : > { %1767 = vmatpush3.bf16.xpose.msra.mxu1 %v698_v42  ;;  %1768 = vmatprep.mubr.msk.bf16.mxu1 %vm2140_vm0, %v2139_v0 }
 0x1d4   : > { %1778 = vmatprep.subr.bf16.mxu1 %v2139_v0 }
 0x1d5   : > { %v517_v44 = vpop.permute.xlu1 %516  ;;  %v502_v45 = vpop.permute.xlu0 %501  ;;  %v544_v47 = vld [vmem:[#allocation3 + $0x14] sm:$0xf]  ;;  %v545_v52 = vld [vmem:[#allocation3 + $0x18] sm:$0xf] }
 0x1d6   : > { %520 = vst.msk [vmem:[#allocation2 + $0x1c] sm:$0xf] %vm344_vm2, %v517_v44  ;;  %505 = vst.msk [vmem:[#allocation2 + $0x18] sm:$0xf] %vm344_vm2, %v502_v45  ;;  %1763 = vmatmul.mubr.msk.bf16.vlgmr.msra.gmra.mrb[8].mxu0 %vm555_vm3, %v533_v46  ;;  %v790_v51 = vsel %vm555_vm3, %v544_v47, 0  ;;  %v836_v56 = vsel %vm555_vm3, %v545_v52, 0 }
 0x1d7   : > { %1773 = vmatpush3.bf16.xpose.msra.mxu0 %v744_v43  ;;  %1774 = vmatprep.mubr.msk.bf16.mxu0 %vm2140_vm0, %v2139_v0 }
 0x1d8   : > { %1784 = vmatprep.subr.bf16.mxu0 %v2139_v0 }
 0x1d9   : > { %v354_v48 = vpop.permute.xlu1 %353  ;;  %v368_v49 = vpop.permute.xlu0 %367  ;;  %v546_v57 = vld [vmem:[#allocation3 + $0x1c] sm:$0xf]  ;;  %v536_v59 = vld [vmem:[#allocation2 + $0x14] sm:$0xf] }
 0x1da   : > { %356 = vst.msk [vmem:[#allocation4] sm:$0xf] %vm344_vm2, %v354_v48  ;;  %371 = vst.msk [vmem:[#allocation4 + $0x4] sm:$0xf] %vm344_vm2, %v368_v49  ;;  %1769 = vmatmul.mubr.msk.bf16.vlgmr.msra.gmra.mrb[8].mxu1 %vm555_vm3, %v534_v50  ;;  %v882_v60 = vsel %vm555_vm3, %v546_v57, 0 }
 0x1db   : > { %1779 = vmatpush3.bf16.xpose.msra.mxu1 %v790_v51  ;;  %1780 = vmatprep.mubr.msk.bf16.mxu1 %vm2140_vm0, %v2139_v0 }
 0x1dc   : > { %1790 = vmatprep.subr.bf16.mxu1 %v2139_v0 }
 0x1dd   : > { %v383_v53 = vpop.permute.xlu1 %382  ;;  %v398_v54 = vpop.permute.xlu0 %397  ;;  %v537_v63 = vld [vmem:[#allocation2 + $0x18] sm:$0xf]  ;;  %v538_v3 = vld [vmem:[#allocation2 + $0x1c] sm:$0xf] }
 0x1de   : > { %386 = vst.msk [vmem:[#allocation4 + $0x8] sm:$0xf] %vm344_vm2, %v383_v53  ;;  %401 = vst.msk [vmem:[#allocation4 + $0xc] sm:$0xf] %vm344_vm2, %v398_v54  ;;  %1775 = vmatmul.mubr.msk.bf16.vlgmr.msra.gmra.mrb[12].mxu0 %vm555_vm3, %v535_v55 }
 0x1df   : > { %1785 = vmatpush3.bf16.xpose.msra.mxu0 %v836_v56  ;;  %1786 = vmatprep.mubr.msk.bf16.mxu0 %vm2140_vm0, %v2139_v0 }
 0x1e0   : > { %1796 = vmatprep.subr.bf16.mxu0 %v2139_v0 }
 0x1e1   : > { %v482_v58 = vpop.permute.xlu1 %481  ;;  %v547_v61 = vld [vmem:[#allocation4] sm:$0xf]  ;;  %v548_v2 = vld [vmem:[#allocation4 + $0x4] sm:$0xf] }
 0x1e2   : > { %485 = vst.msk [vmem:[#allocation4 + $0x10] sm:$0xf] %vm344_vm2, %v482_v58  ;;  %1781 = vmatmul.mubr.msk.bf16.vlgmr.msra.gmra.mrb[12].mxu1 %vm555_vm3, %v536_v59  ;;  %v1024_v1 = vsel %vm1022_vm4, %v547_v61, 0  ;;  %v1070_v4 = vsel %vm1022_vm4, %v548_v2, 0 }
 0x1e3   : > { %1791 = vmatpush3.bf16.xpose.msra.mxu1 %v882_v60  ;;  %1792 = vmatprep.mubr.msk.bf16.mxu1 %vm2140_vm0, %v2139_v0 }
 0x1e4   : > { %1802 = vmatprep.subr.bf16.mxu1 %v2139_v0 }
 0x1e5   : > { %v497_v62 = vpop.permute.xlu1 %496  ;;  %v549_v8 = vld [vmem:[#allocation4 + $0x8] sm:$0xf] }
 0x1e6   : > { %500 = vst.msk [vmem:[#allocation4 + $0x14] sm:$0xf] %vm344_vm2, %v497_v62  ;;  %1787 = vmatmul.mubr.msk.bf16.vlgmr.msra.gmra.mrb[16].mxu0 %vm555_vm3, %v537_v63 }
 0x1e7   : > { %1797 = vmatpush3.bf16.msra.mxu0 %v1024_v1  ;;  %1798 = vmatprep.mubr.msk.bf16.mxu0 %vm2140_vm0, %v2139_v0 }
 0x1e8   : > { %1808 = vmatprep.subr.bf16.mxu0 %v2139_v0 }
 0x1ea   : > { %1793 = vmatmul.mubr.msk.bf16.vlgmr.msra.gmra.mrb[16].mxu1 %vm555_vm3, %v538_v3 }
 0x1eb   : > { %1803 = vmatpush3.bf16.msra.mxu1 %v1070_v4  ;;  %1804 = vmatprep.mubr.msk.bf16.mxu1 %vm2140_vm0, %v2139_v0 }
 0x1ec   : > { %1814 = vmatprep.subr.bf16.mxu1 %v2139_v0 }
 0x2a1   : > { %v596_v9 = vpop.f32.mrb[4].mxu0 }
 0x2a2   : > { %v931_v10 = vsel %vm2483_vm5, %v596_v9, -1e+30  ;;  %v1752_v11 = vpop.f32.mrb[5].mxu0 }
 0x2a3   : > { %v599_v12 = vpop.f32.mrb[6].mxu0  ;;  %v939_v13 = vsel %vm555_vm3, %v931_v10, -inf  ;;  %v1116_v11 = vsel %vm1022_vm4, %v549_v8, 0 }
 0x2a4   : > { %940 = vmax.xlane.f32.xlu0 %v939_v13  ;;  %v1753_v14 = vpop.f32.mrb[7].mxu0 }
 0x2a5   : > { %v642_v15 = vpop.f32.mrb[4].mxu1  ;;  %v550_v14 = vld [vmem:[#allocation4 + $0xc] sm:$0xf] }
 0x2a6   : > { %v932_v16 = vsel %vm2483_vm5, %v642_v15, -1e+30  ;;  %v1758_v17 = vpop.f32.mrb[5].mxu1 }
 0x2a7   : > { %v645_v19 = vpop.f32.mrb[6].mxu1  ;;  %v942_v20 = vsel %vm555_vm3, %v932_v16, -inf }
 0x2a8   : > { %943 = vmax.xlane.f32.xlu1 %v942_v20  ;;  %v1759_v21 = vpop.f32.mrb[7].mxu1  ;;  %v1162_v20 = vsel %vm1022_vm4, %v550_v14, 0 }
 0x2a9   : > { %v688_v22 = vpop.f32.mrb[8].mxu0 }
 0x2aa   : > { %v933_v23 = vsel %vm2483_vm5, %v688_v22, -1e+30  ;;  %v1764_v24 = vpop.f32.mrb[9].mxu0 }
 0x2ab   : > { %v691_v25 = vpop.f32.mrb[10].mxu0  ;;  %v945_v26 = vsel %vm555_vm3, %v933_v23, -inf }
 0x2ac   : > { %946 = vmax.xlane.f32.xlu0 %v945_v26  ;;  %v1765_v27 = vpop.f32.mrb[11].mxu0 }
 0x2ad   : > { %v734_v28 = vpop.f32.mrb[8].mxu1 }
 0x2ae   : > { %v934_v29 = vsel %vm2483_vm5, %v734_v28, -1e+30  ;;  %v1770_v30 = vpop.f32.mrb[9].mxu1 }
 0x2af   : > { %v737_v31 = vpop.f32.mrb[10].mxu1  ;;  %v948_v32 = vsel %vm555_vm3, %v934_v29, -inf  ;;  %v552_v30 = vld [vmem:[#allocation4 + $0x14] sm:$0xf] }
 0x2b0   : > { %v1771_v33 = vpop.f32.mrb[11].mxu1  ;;  %949 = vmax.xlane.f32.xlu0 %v948_v32 }
 0x2b1   : > { %v780_v34 = vpop.f32.mrb[12].mxu0 }
 0x2b2   : > { %v935_v35 = vsel %vm2483_vm5, %v780_v34, -1e+30  ;;  %v1776_v36 = vpop.f32.mrb[13].mxu0 }
 0x2b3   : > { %v783_v37 = vpop.f32.mrb[14].mxu0  ;;  %v951_v38 = vsel %vm555_vm3, %v935_v35, -inf }
 0x2b4   : > { %952 = vmax.xlane.f32.xlu1 %v951_v38  ;;  %v1777_v39 = vpop.f32.mrb[15].mxu0 }
 0x2b5   : > { %v826_v40 = vpop.f32.mrb[12].mxu1 }
 0x2b6   : > { %v936_v41 = vsel %vm2483_vm5, %v826_v40, -1e+30  ;;  %v1782_v42 = vpop.f32.mrb[13].mxu1 }
 0x2b7   : > { %v829_v43 = vpop.f32.mrb[14].mxu1  ;;  %v954_v44 = vsel %vm555_vm3, %v936_v41, -inf }
 0x2b8   : > { %v1783_v45 = vpop.f32.mrb[15].mxu1  ;;  %955 = vmax.xlane.f32.xlu0 %v954_v44 }
 0x2b9   : > { %v872_v46 = vpop.f32.mrb[16].mxu0 }
 0x2ba   : > { %v2507_v47 = vsel %vm2483_vm5, %v872_v46, -1e+30  ;;  %v1788_v48 = vpop.f32.mrb[17].mxu0 }
 0x2bb   : > { %v875_v49 = vpop.f32.mrb[18].mxu0  ;;  %v957_v50 = vsel %vm555_vm3, %v2507_v47, -inf }
 0x2bc   : > { %958 = vmax.xlane.f32.xlu1 %v957_v50  ;;  %v1789_v51 = vpop.f32.mrb[19].mxu0 }
 0x2bd   : > { %v918_v52 = vpop.f32.mrb[16].mxu1 }
 0x2be   : > { %v2513_v53 = vsel %vm2483_vm5, %v918_v52, -1e+30  ;;  %v1794_v54 = vpop.f32.mrb[17].mxu1 }
 0x2bf   : > { %v921_v55 = vpop.f32.mrb[18].mxu1  ;;  %v960_v56 = vsel %vm555_vm3, %v2513_v53, -inf }
 0x2c0   : > { %v1795_v57 = vpop.f32.mrb[19].mxu1  ;;  %961 = vmax.xlane.f32.xlu0 %v960_v56 }
 0x2cd   : > { %526 = vrot.lane.b32.xlu1 %v2402_v18, %s2151_s8 }
 0x2d6   : > { %511 = vrot.lane.b32.xlu0 %v2402_v18, %s2150_s7  ;;  %s2155_s7 = smov [#allocation12]  }
 0x2d7   : > { %s2066_s8 = sshll.u32 %s2155_s7, 4  ;;  %s2067_s8 = int_to_ptr.vmem [resolvable:$false] %s2066_s8 }
 0x2d8   : > { %p2069_p7 = scmp.lt.s32.totalorder %s2589_s13, %s2067_s8 }
 0x331   : > { %v941_v58 = vpop.xlane.xlu0 %940 }
 0x332   : > { %v963_v59 = vsub.f32 %v931_v10, %v941_v58 }
 0x334   : > { %v971_v60 = vmul.f32 1.442695, %v963_v59 }
 0x335   : > { %v944_v61 = vpop.xlane.xlu1 %943 }
 0x336   : > { %1944 = vpow2.f32 %v971_v60  ;;  %v964_v62 = vsub.f32 %v932_v16, %v944_v61 }
 0x338   : > { %v973_v63 = vmul.f32 1.442695, %v964_v62 }
 0x339   : > { %v947_v1 = vpop.xlane.xlu0 %946 }
 0x33a   : > { %1946 = vpow2.f32 %v973_v63  ;;  %v965_v2 = vsub.f32 %v933_v23, %v947_v1  ;;  %v551_v23 = vld [vmem:[#allocation4 + $0x10] sm:$0xf] }
 0x33b   : > { %v1208_v27 = vsel %vm1022_vm4, %v551_v23, 0 }
 0x33c   : > { %v975_v3 = vmul.f32 1.442695, %v965_v2 }
 0x33d   : > { %v950_v4 = vpop.xlane.xlu0 %949 }
 0x33e   : > { %1948 = vpow2.f32 %v975_v3  ;;  %v966_v5 = vsub.f32 %v934_v29, %v950_v4 }
 0x340   : > { %v2521_v6 = vpop.eup %1944  ;;  %v977_v7 = vmul.f32 1.442695, %v966_v5 }
 0x341   : > { %v953_v9 = vpop.xlane.xlu1 %952  ;;  %v1011_v18 = vpack.c.bf16 %v2521_v6, %v2521_v6  ;;  %v987_v56 = vsel %vm555_vm3, %v2521_v6, 0.0 }
 0x342   : > { %1950 = vpow2.f32 %v977_v7  ;;  %v967_v10 = vsub.f32 %v935_v35, %v953_v9  ;;  %v1254_v35 = vsel %vm1022_vm4, %v552_v30, 0 }
 0x343   : > { %1799 = vmatmul.mubr.msk.bf16.vlgmr.msra.gmra.mrb[20].mxu0 %vm555_vm3, %v1011_v18 }
 0x344   : > { %v1947_v12 = vpop.eup %1946  ;;  %v979_v13 = vmul.f32 1.442695, %v967_v10  ;;  %1809 = vmatpush3.bf16.msra.mxu0 %v1116_v11  ;;  %1810 = vmatprep.mubr.msk.bf16.mxu0 %vm2140_vm0, %v2139_v0 }
 0x345   : > { %v956_v15 = vpop.xlane.xlu0 %955  ;;  %v990_v16 = vsel %vm555_vm3, %v1947_v12, 0.0  ;;  %v1012_v17 = vpack.c.bf16 %v1947_v12, %v1947_v12  ;;  %1820 = vmatprep.subr.bf16.mxu0 %v2139_v0 }
 0x346   : > { %1952 = vpow2.f32 %v979_v13  ;;  %v968_v19 = vsub.f32 %v936_v41, %v956_v15  ;;  %991 = vadd.xlane.f32.xlu0 %v990_v16 }
 0x347   : > { %1805 = vmatmul.mubr.msk.bf16.vlgmr.msra.gmra.mrb[20].mxu1 %vm555_vm3, %v1012_v17 }
 0x348   : > { %v1949_v21 = vpop.eup %1948  ;;  %v981_v22 = vmul.f32 1.442695, %v968_v19  ;;  %1815 = vmatpush3.bf16.msra.mxu1 %v1162_v20  ;;  %1816 = vmatprep.mubr.msk.bf16.mxu1 %vm2140_vm0, %v2139_v0 }
 0x349   : > { %v959_v24 = vpop.xlane.xlu1 %958  ;;  %v1013_v25 = vpack.c.bf16 %v1949_v21, %v1949_v21  ;;  %1826 = vmatprep.subr.bf16.mxu1 %v2139_v0 }
 0x34a   : > { %1954 = vpow2.f32 %v981_v22  ;;  %v969_v26 = vsub.f32 %v2507_v47, %v959_v24 }
 0x34b   : > { %1811 = vmatmul.mubr.msk.bf16.vlgmr.msra.gmra.mrb[24].mxu0 %vm555_vm3, %v1013_v25 }
 0x34c   : > { %v1951_v28 = vpop.eup %1950  ;;  %v983_v29 = vmul.f32 1.442695, %v969_v26  ;;  %1821 = vmatpush3.bf16.msra.mxu0 %v1208_v27  ;;  %1822 = vmatprep.mubr.msk.bf16.mxu0 %vm2140_vm0, %v2139_v0 }
 0x34d   : > { %v962_v31 = vpop.xlane.xlu0 %961  ;;  %v527_v32 = vpop.permute.xlu1 %526  ;;  %v1014_v33 = vpack.c.bf16 %v1951_v28, %v1951_v28  ;;  %1832 = vmatprep.subr.bf16.mxu0 %v2139_v0  ;;  %v996_v54 = vsel %vm555_vm3, %v1951_v28, 0.0 }
 0x34e   : > { %1956 = vpow2.f32 %v983_v29  ;;  %v970_v34 = vsub.f32 %v2513_v53, %v962_v31  ;;  %530 = vst.msk [vmem:[#allocation4 + $0x1c] sm:$0xf] %vm344_vm2, %v527_v32  ;;  %v993_v53 = vsel %vm555_vm3, %v1949_v21, 0.0 }
 0x34f   : > { %1817 = vmatmul.mubr.msk.bf16.vlgmr.msra.gmra.mrb[24].mxu1 %vm555_vm3, %v1014_v33 }
 0x350   : > { %v1953_v36 = vpop.eup %1952  ;;  %v985_v37 = vmul.f32 1.442695, %v970_v34  ;;  %1827 = vmatpush3.bf16.msra.mxu1 %v1254_v35  ;;  %1828 = vmatprep.mubr.msk.bf16.mxu1 %vm2140_vm0, %v2139_v0 }
 0x351   : > { %v512_v38 = vpop.permute.xlu0 %511  ;;  %v1015_v39 = vpack.c.bf16 %v1953_v36, %v1953_v36  ;;  %1838 = vmatprep.subr.bf16.mxu1 %v2139_v0  ;;  %v999_v55 = vsel %vm555_vm3, %v1953_v36, 0.0 }
 0x352   : > { %1958 = vpow2.f32 %v985_v37  ;;  %515 = vst.msk [vmem:[#allocation4 + $0x18] sm:$0xf] %vm344_vm2, %v512_v38 }
 0x353   : > { %1823 = vmatmul.mubr.msk.bf16.vlgmr.msra.gmra.mrb[28].mxu0 %vm555_vm3, %v1015_v39 }
 0x354   : > { %v1955_v40 = vpop.eup %1954  ;;  %1834 = vmatprep.mubr.msk.bf16.mxu0 %vm2140_vm0, %v2139_v0 }
 0x355   : > { %v1002_v41 = vsel %vm555_vm3, %v1955_v40, 0.0  ;;  %v1016_v42 = vpack.c.bf16 %v1955_v40, %v1955_v40  ;;  %v554_v43 = vld [vmem:[#allocation4 + $0x1c] sm:$0xf] }
 0x356   : > { %1003 = vadd.xlane.f32.xlu0 %v1002_v41  ;;  %v1346_v44 = vsel %vm1022_vm4, %v554_v43, 0 }
 0x357   : > { %1829 = vmatmul.mubr.msk.bf16.vlgmr.msra.gmra.mrb[28].mxu1 %vm555_vm3, %v1016_v42 }
 0x358   : > { %v1957_v45 = vpop.eup %1956  ;;  %1839 = vmatpush3.bf16.msra.mxu1 %v1346_v44  ;;  %1840 = vmatprep.mubr.msk.bf16.mxu1 %vm2140_vm0, %v2139_v0 }
 0x359   : > { %v1005_v46 = vsel %vm555_vm3, %v1957_v45, 0.0  ;;  %v553_v47 = vld [vmem:[#allocation4 + $0x18] sm:$0xf]  ;;  %v1017_v50 = vpack.c.bf16 %v1957_v45, %v1957_v45  ;;  %v1942_v45 = vld [vmem:[#allocation11] sm:$0xff]  }
 0x35a   : > { %1006 = vadd.xlane.f32.xlu1 %v1005_v46  ;;  %v1300_v48 = vsel %vm1022_vm4, %v553_v47, 0 }
 0x35b   : > { %1833 = vmatpush3.bf16.msra.mxu0 %v1300_v48  ;;  %v1943_v48 = vld [vmem:[#allocation11 + $0x8] sm:$0xff]  }
 0x35c   : > { %v1959_v49 = vpop.eup %1958  ;;  %1844 = vmatprep.subr.bf16.mxu0 %v2139_v0 }
 0x35d   : > { %v1008_v51 = vsel %vm555_vm3, %v1959_v49, 0.0  ;;  %v1018_v52 = vpack.c.bf16 %v1959_v49, %v1959_v49 }
 0x35e   : > { %1009 = vadd.xlane.f32.xlu0 %v1008_v51  ;;  %1835 = vmatmul.mubr.msk.bf16.vlgmr.msra.gmra.mrb[32].mxu0 %vm555_vm3, %v1017_v50 }
 0x35f   : > { %994 = vadd.xlane.f32.xlu1 %v993_v53  ;;  %1841 = vmatmul.mubr.msk.bf16.vlgmr.msra.gmra.mrb[32].mxu1 %vm555_vm3, %v1018_v52 }
 0x360   : > { %1848 = vmatprep.mubr.msk.bf16.mxu0 %vm2140_vm0, %v2139_v0  ;;  %1845 = vmatpush3.bf16.msra.mxu0 %v1942_v45 }
 0x361   : > { %1846 = vmatprep.subr.bf16.mxu0 %v2139_v0 }
 0x362   : > { %997 = vadd.xlane.f32.xlu0 %v996_v54 }
 0x363   : > { %1000 = vadd.xlane.f32.xlu1 %v999_v55 }
 0x364   : > { %1847 = vmatpush3.bf16.msra.mxu0 %v1943_v48 }
 0x366   : > { %988 = vadd.xlane.f32.xlu0 %v987_v56 }
 0x3d3   : > { %v992_v57 = vpop.xlane.xlu0 %991 }
 0x3e3   : > { %v1004_v58 = vpop.xlane.xlu0 %1003 }
 0x3e7   : > { %v1007_v62 = vpop.xlane.xlu1 %1006 }
 0x3eb   : > { %v1010_v59 = vpop.xlane.xlu0 %1009 }
 0x3ec   : > { %v995_v63 = vpop.xlane.xlu1 %994 }
 0x3ef   : > { %v998_v60 = vpop.xlane.xlu0 %997 }
 0x3f0   : > { %v1001_v7 = vpop.xlane.xlu1 %1000 }
 0x3f3   : > { %v989_v61 = vpop.xlane.xlu0 %988 }
 0x3f4   : > { %1960 = vrcp.f32 %v989_v61 }
 0x3f5   : > { %1962 = vrcp.f32 %v992_v57 }
 0x3f6   : > { %1964 = vrcp.f32 %v995_v63 }
 0x3f7   : > { %1966 = vrcp.f32 %v1001_v7 }
 0x3f8   : > { %1968 = vrcp.f32 %v1004_v58 }
 0x3f9   : > { %1970 = vrcp.f32 %v998_v60 }
 0x3fa   : > { %1972 = vrcp.f32 %v1007_v62 }
 0x3fb   : > { %1974 = vrcp.f32 %v1010_v59 }
 0x3fe   : > { %v1961_v1 = vpop.eup %1960 }
 0x3ff   : > { %v1963_v6 = vpop.eup %1962 }
 0x400   : > { %v1965_v15 = vpop.eup %1964 }
 0x401   : > { %v1967_v27 = vpop.eup %1966 }
 0x402   : > { %v1969_v34 = vpop.eup %1968 }
 0x403   : > { %v1971_v42 = vpop.eup %1970 }
 0x404   : > { %v1973_v46 = vpop.eup %1972 }
 0x405   : > { %v1975_v49 = vpop.eup %1974 }
 0x416   : > { %v1060_v2 = vpop.f32.mrb[20].mxu0 }
 0x417   : > { %v1396_v3 = vmul.f32 %v1961_v1, %v1060_v2  ;;  %v1800_v4 = vpop.f32.mrb[21].mxu0 }
 0x418   : > { %v1063_v5 = vpop.f32.mrb[22].mxu0 }
 0x419   : > { %v1404_v8 = vpack.c.bf16 %v1396_v3, %v1396_v3  ;;  %v1801_v9 = vpop.f32.mrb[23].mxu0 }
 0x41a   : > { %v1106_v18 = vpop.f32.mrb[20].mxu1 }
 0x41b   : > { %1412 = vst.msk [vmem:[#allocation5] sm:$0xf] %vm344_vm2, %v1404_v8  ;;  %v1397_v10 = vmul.f32 %v1963_v6, %v1106_v18  ;;  %v1806_v11 = vpop.f32.mrb[21].mxu1  ;;  %v1677_v8 = vld [vmem:[%s2639_s4] ss:$0 sm:$0xff] }
 0x41c   : > { %v1109_v12 = vpop.f32.mrb[22].mxu1 }
 0x41d   : > { %v1405_v13 = vpack.c.bf16 %v1397_v10, %v1397_v10  ;;  %v1807_v14 = vpop.f32.mrb[23].mxu1 }
 0x41e   : > { %v1152_v16 = vpop.f32.mrb[24].mxu0 }
 0x41f   : > { %v1398_v17 = vmul.f32 %v1965_v15, %v1152_v16  ;;  %1414 = vrot.lane.b32.xlu1 %v1405_v13, %s2152_s12  ;;  %v1812_v19 = vpop.f32.mrb[25].mxu0 }
 0x420   : > { %v1155_v20 = vpop.f32.mrb[26].mxu0 }
 0x421   : > { %v1406_v21 = vpack.c.bf16 %v1398_v17, %v1398_v17  ;;  %v1813_v22 = vpop.f32.mrb[27].mxu0 }
 0x422   : > { %v1198_v23 = vpop.f32.mrb[24].mxu1 }
 0x423   : > { %v1818_v24 = vpop.f32.mrb[25].mxu1  ;;  %1420 = vrot.lane.b32.xlu1 %v1406_v21, %s2153_s24  ;;  %v1399_v43 = vmul.f32 %v1971_v42, %v1198_v23 }
 0x424   : > { %v1201_v25 = vpop.f32.mrb[26].mxu1 }
 0x425   : > { %v1819_v26 = vpop.f32.mrb[27].mxu1  ;;  %v1407_v53 = vpack.c.bf16 %v1399_v43, %v1399_v43 }
 0x426   : > { %v1244_v28 = vpop.f32.mrb[28].mxu0 }
 0x427   : > { %v1400_v29 = vmul.f32 %v1967_v27, %v1244_v28  ;;  %v1824_v30 = vpop.f32.mrb[29].mxu0 }
 0x428   : > { %v1247_v31 = vpop.f32.mrb[30].mxu0 }
 0x429   : > { %v1408_v32 = vpack.c.bf16 %v1400_v29, %v1400_v29  ;;  %v1825_v33 = vpop.f32.mrb[31].mxu0 }
 0x42a   : > { %v1290_v35 = vpop.f32.mrb[28].mxu1 }
 0x42b   : > { %v1432_v36 = vrot.slane %v1408_v32, 4  ;;  %v1401_v37 = vmul.f32 %v1969_v34, %v1290_v35  ;;  %v1830_v38 = vpop.f32.mrb[29].mxu1 }
 0x42c   : > { %v1293_v39 = vpop.f32.mrb[30].mxu1 }
 0x42d   : > { %1435 = vst.msk [vmem:[#allocation5] sm:$0xf0] %vm1434_vm6, %v1432_v36  ;;  %v1409_v40 = vpack.c.bf16 %v1401_v37, %v1401_v37  ;;  %v1831_v41 = vpop.f32.mrb[31].mxu1 }
 0x42f   : > { %v1437_v44 = vrot.slane %v1409_v40, 4 }
 0x431   : > { %1438 = vrot.lane.b32.xlu0 %v1437_v44, %s2152_s12  ;;  %v1336_v47 = vpop.f32.mrb[32].mxu0  ;;  %s2068_s12 = scalar_lea.vmem %s2067_s8, 256 }
 0x432   : > { %v1402_v50 = vmul.f32 %v1973_v46, %v1336_v47  ;;  %v1836_v51 = vpop.f32.mrb[33].mxu0  ;;  %v1382_v52 = vpop.f32.mrb[32].mxu1  ;;  %p2070_p9 = scmp.lt.s32.totalorder %s2068_s12, %s2062_s6 }
 0x433   : > { %v1403_v54 = vmul.f32 %v1975_v49, %v1382_v52  ;;  %v1339_v55 = vpop.f32.mrb[34].mxu0  ;;  %v1842_v56 = vpop.f32.mrb[33].mxu1 }
 0x434   : > { %v1410_v57 = vpack.c.bf16 %v1402_v50, %v1402_v50  ;;  %v1837_v58 = vpop.f32.mrb[35].mxu0  ;;  %v1385_v59 = vpop.f32.mrb[34].mxu1  ;;  %p2071_p12 = por %p2070_p9, %p2069_p7 }
 0x435   : > { %1426 = vrot.lane.b32.xlu0 %v1407_v53, %s2154_s26  ;;  %v1843_v60 = vpop.f32.mrb[35].mxu1  ;;  %v1411_v62 = vpack.c.bf16 %v1403_v54, %v1403_v54 }
 0x436   : > { %v1444_v61 = vrot.slane %v1410_v57, 4  ;;  %p2072_p1 = pnand %p2071_p12, %p2065_p3 }
 0x437   : > { %v1451_v63 = vrot.slane %v1411_v62, 4 }
 0x438   : > { %1445 = vrot.lane.b32.xlu1 %v1444_v61, %s2153_s24 }
 0x43c   : > { %1452 = vrot.lane.b32.xlu1 %v1451_v63, %s2154_s26 }
 0x491   : > { %v1415_v1 = vpop.permute.xlu1 %1414 }
 0x492   : > { %1418 = vst.msk [vmem:[#allocation5] sm:$0xf] %vm1417_vm7, %v1415_v1 }
 0x495   : > { %v1421_v0 = vpop.permute.xlu1 %1420 }
 0x496   : > { %1424 = vst.msk [vmem:[#allocation5] sm:$0xf] %vm1423_vm8, %v1421_v0 }
 0x4a3   : > { %v1439_v2 = vpop.permute.xlu0 %1438 }
 0x4a4   : > { %1442 = vst.msk [vmem:[#allocation5] sm:$0xf0] %vm1441_vm9, %v1439_v2 }
 0x4a7   : > { %v1427_v3 = vpop.permute.xlu0 %1426 }
 0x4a8   : > { %1430 = vst.msk [vmem:[#allocation5] sm:$0xf] %vm1429_vm10, %v1427_v3 }
 0x4aa   : > { %v1446_v4 = vpop.permute.xlu1 %1445 }
 0x4ab   : > { %1449 = vst.msk [vmem:[#allocation5] sm:$0xf0] %vm1448_vm11, %v1446_v4 }
 0x4ae   : > { %v1453_v5 = vpop.permute.xlu1 %1452 }
 0x4af   : > { %1456 = vst.msk [vmem:[#allocation5] sm:$0xf0] %vm1455_vm12, %v1453_v5 }
 0x4b6   : > { %v1457_v7 = vld [vmem:[#allocation5] sm:$0xff] }
 0x4b7   : > { %1849 = vmatmul.mubr.msk.bf16.vlgmr.msra.gmra.mrb[36].mxu0 %vm299_vm1, %v1457_v7 }
 0x58a   : > { %v1518_v9 = vpop.f32.mrb[36].mxu0 }
 0x58b   : > { %v1519_v6 = vadd.f32 %v1677_v8, %v1518_v9  ;;  %v1850_v18 = vpop.f32.mrb[37].mxu0 }
 0x58c   : > { %v1521_v10 = vpop.f32.mrb[38].mxu0 }
 0x58d   : > { %v1525_v11 = vpack.c.bf16 %v1519_v6, %v1519_v6  ;;  %v1522_v12 = vadd.f32 %v1677_v8, %v1521_v10  ;;  %v1851_v13 = vpop.f32.mrb[39].mxu0 }
 0x58f   : > { %1527 = vst.msk [vmem:[%s271_s28] sm:$0xf] %vm1526_vm13, %v1525_v11  ;;  %v1528_v14 = vpack.c.bf16 %v1522_v12, %v1522_v12 }
 0x591   : > { %1681 = vst.msk [vmem:[%s271_s28 + $0x4] sm:$0xf] %vm1526_vm13, %v1528_v14 }
 0x592   : > { %2075 = shalt.err (!%p2072_p1)
}
 0x593   : > { %s2076_s24 = scalar_lea.hbm %s2587_s17, 128  ;;  %s2080_s16 = scalar_lea.hbm %s2640_s5, 256 }
 0x594   : > { %p2077_p13 = scmp.ne.s32.totalorder %s2587_s17, %s2076_s24  ;;  %p2081_p4 = scmp.lt.u32.totalorder %s2587_s17, %s2640_s5 }
 0x595   : > { %p2082_p5 = scmp.lt.u32.totalorder %s2080_s16, %s2076_s24  ;;  %p2084_p11 = scmp.lt.u32.totalorder %s2076_s24, %s2587_s17 }
 0x596   : > { %p2078_p6 = pnand %p2077_p13, %p2656_p0 }
 0x597   : > { %p2083_p8 = por %p2082_p5, %p2081_p4 }
 0x598   : > { %p2079_p10 = pneg %p2078_p6 }
 0x599   : > { %p2085_p2 = por %p2084_p11, %p2083_p8 }
 0x59b   : > { %p2086_p3 = pnand %p2085_p2, %p2079_p10 }
 0x59d   : > { %2089 = shalt.err (!%p2086_p3)
}
 0x59e   : > { %s2156_s9 = smov 4  }
 0x59f   : > { %1862 = dma.vmem_to_hbm [thread:$0]  (%p2656_p0), %s2589_s13, 128, %s2587_s17, %s1532_s22, %s2148_s11, %s2148_s11, %s2156_s9  }
 0x5a0 PF: > { %s1560_s30 = sand.u32 1, %s2120_s18   ;;  %p2657_p7 = scmp.ne.s32.totalorder %s2645_s25, 0 }
 0x5a1   : > { %p2658_p9 = scmp.ge.s32.totalorder %s2132_s21, 2  ;;  %s1561_s6 = scalar_lea.sflag [#allocation8], %s1560_s30 }
 0x5a3   : > { %p1876_p12 = pnand %p2658_p9, %p2657_p7 }
 0x5a5   : > { %2115 = dma.done.wait (!%p1876_p12), %s1561_s6, 128  }
 0x5a6   : > { %2117 = vsyncadd (!%p1876_p12), %s1561_s6, 4294967168  ;;  %p19_p1 = scmp.ge.s32.totalorder %s2303_s29, 4   ;;  %s2659_s18 = smov %s2124_s19 }
 0x5a7   : > { %s2660_s19 = smov %s2128_s20  ;;  %s2661_s20 = smov %s2319_s27 }
 0x5a8   : > { %s2662_s21 = smov %s2303_s29  ;;  %21 = sbr.rel (!%p19_p1) target bundleno = 6 (0x6), region = 116 }
 0x5af   :  { %1566 = vsyncpa [#allocation7], 1 }
 0x5b0   :  { %1568 = vsyncpa [#allocation7 + $0x1], 1 }
 0x5b1   :  { %1569 = vsyncpa [#allocation10], 1 }
 0x5b2   :  { %1570 = vsyncpa [#allocation8], 1 }
 0x5b3   :  { %1572 = vsyncpa [#allocation8 + $0x1], 1 }

</bundles_post_ra>
